<compile_context>
chip_gen: v5e
topology: v5e:2x2
jax: 0.10.0
libtpu: 0.0.40
codegen_flags: <defaults>
</compile_context>

<pallas_src>
import functools

import jax
import jax.numpy as jnp
from jax.experimental import pallas as pl
from jax.experimental.pallas import tpu as pltpu

LRELU_SLOPE = 0.2
BN_EPS = 0.8              # nn.BatchNorm2d(C, 0.8): second positional arg is eps
MAX_HEAD_TILE_ROWS = 256
VMEM_LIMIT_BYTES = 32 * 1024 * 1024  # safe on v5e/v6e (128 MiB) and v7x (64 MiB)


# ---------------------------------------------------------------------------
# Pallas kernels
# ---------------------------------------------------------------------------
def _conv_block_kernel(l_ref, r_ref, w_ref, b_ref, shift_ref, o_ref, *, wo):
    """One image of a discriminator block.

    Stride-2 3x3 conv expressed as 4 space-to-depth tap GEMMs (bf16 MXU, f32
    acc), fused with the folded bias, LeakyReLU(0.2) and the eval-BN shift.

    l_ref / r_ref: (1, (Ho+1)*Wo, 4*Cin)  left / right column-tap views of the
                   top/left zero-padded space-to-depth input.
    w_ref:         (4, 4*Cin, Cout)       tap weights, tap index = dh*2 + dw.
    b_ref/shift_ref: (1, Cout) f32.
    o_ref:         (1, Ho*Wo, Cout) bf16.
    """
    hw = o_ref.shape[1]                                  # Ho*Wo (static)
    acc = jnp.dot(l_ref[0, 0:hw, :], w_ref[0],            # (dh=0, dw=0)
                  preferred_element_type=jnp.float32)
    acc += jnp.dot(r_ref[0, 0:hw, :], w_ref[1],           # (dh=0, dw=1)
                   preferred_element_type=jnp.float32)
    acc += jnp.dot(l_ref[0, wo:wo + hw, :], w_ref[2],     # (dh=1, dw=0)
                   preferred_element_type=jnp.float32)
    acc += jnp.dot(r_ref[0, wo:wo + hw, :], w_ref[3],     # (dh=1, dw=1)
                   preferred_element_type=jnp.float32)
    y = acc + b_ref[...]                                   # folded conv bias (f32)
    y = jnp.where(y > 0, y, LRELU_SLOPE * y)                # LeakyReLU(0.2)
    y = y + shift_ref[...]                                  # eval-mode BN shift
    o_ref[0] = y.astype(o_ref.dtype)


def _heads_kernel(x_ref, w_ref, b_ref, o_ref, *, aux_start, aux_end):
    """Merged adv/aux/latent heads: one lane-dense matmul; masked softmax on the
    aux lane-slice; other lanes passed through as raw logits."""
    y = jnp.dot(x_ref[...], w_ref[...], preferred_element_type=jnp.float32) + b_ref[...]
    lane = jax.lax.broadcasted_iota(jnp.int32, y.shape, 1)
    in_aux = (lane >= aux_start) & (lane < aux_end)
    neg_big = jnp.asarray(-1e30, jnp.float32)              # avoid feeding inf to EUP
    m = jnp.max(jnp.where(in_aux, y, neg_big), axis=-1, keepdims=True)
    z = jnp.where(in_aux, y, m) - m                         # <= 0 everywhere
    e = jnp.where(in_aux, jnp.exp(z), 0.0)
    sm = e / jnp.sum(e, axis=-1, keepdims=True)
    o_ref[...] = jnp.where(in_aux, sm, y)


# ---------------------------------------------------------------------------
# Tiling helpers
# ---------------------------------------------------------------------------
def _pick_grid(m, max_tile):
    """Return (tile, padded_m, num_tiles); tile == m (full dim) when it fits."""
    if m <= max_tile:
        return m, m, 1
    tile = max_tile
    m_pad = ((m + tile - 1) // tile) * tile
    return tile, m_pad, m_pad // tile


# ---------------------------------------------------------------------------
# pallas_call wrappers
# ---------------------------------------------------------------------------
def conv_block(x_nhwc, wm, b2, shift2):
    """One discriminator block.  wm is the prepared (4, 4*Cin, Cout) bf16 taps."""
    N, H, W, C = x_nhwc.shape
    assert H % 2 == 0 and W % 2 == 0, "stride-2 blocks need even spatial dims"
    Ho, Wo = H // 2, W // 2
    K = 4 * C
    cout = wm.shape[-1]

    # Space-to-depth (block 2): xs[n, bh, bw, (ph*2+pw)*C + c] = x[n, 2bh+ph, 2bw+pw, c]
    xs = x_nhwc.reshape(N, Ho, 2, Wo, 2, C).transpose(0, 1, 3, 2, 4, 5)
    xs = xs.reshape(N, Ho, Wo, K)
    # Pad one zero block on top/left (covers the conv's -1 row/col reads).
    xsp = jnp.pad(xs, ((0, 0), (1, 0), (1, 0), (0, 0)))
    # Column-tap views (dw=0 / dw=1), flattened so the kernel only needs
    # contiguous row slices + 2D GEMMs.  ~2x activation bytes (vs 9x im2col).
    left = xsp[:, :, 0:Wo, :].reshape(N, (Ho + 1) * Wo, K)
    right = xsp[:, :, 1:Wo + 1, :].reshape(N, (Ho + 1) * Wo, K)

    kern = functools.partial(_conv_block_kernel, wo=Wo)
    out = pl.pallas_call(
        kern,
        out_shape=jax.ShapeDtypeStruct((N, Ho * Wo, cout), jnp.bfloat16),
        grid=(N,),
        in_specs=[
            pl.BlockSpec((1, (Ho + 1) * Wo, K), lambda n: (n, 0, 0)),
            pl.BlockSpec((1, (Ho + 1) * Wo, K), lambda n: (n, 0, 0)),
            pl.BlockSpec((4, K, cout), lambda n: (0, 0, 0)),
            pl.BlockSpec((1, cout), lambda n: (0, 0)),
            pl.BlockSpec((1, cout), lambda n: (0, 0)),
        ],
        out_specs=pl.BlockSpec((1, Ho * Wo, cout), lambda n: (n, 0, 0)),
        compiler_params=pltpu.CompilerParams(
            dimension_semantics=("parallel",),
            vmem_limit_bytes=VMEM_LIMIT_BYTES),
    )(left, right, wm, b2, shift2)
    return out.reshape(N, Ho, Wo, cout)


def heads_matmul(flat, w, b, *, aux_start, aux_end):
    """Single merged-heads matmul (lane-dense, 128-wide output) + masked softmax."""
    N, feat = flat.shape
    out_pad = w.shape[1]
    tile_n, n_pad, num_tiles = _pick_grid(N, MAX_HEAD_TILE_ROWS)
    if n_pad != N:
        flat = jnp.pad(flat, ((0, n_pad - N), (0, 0)))
    kern = functools.partial(_heads_kernel, aux_start=aux_start, aux_end=aux_end)
    out = pl.pallas_call(
        kern,
        out_shape=jax.ShapeDtypeStruct((n_pad, out_pad), jnp.float32),
        grid=(num_tiles,),
        in_specs=[pl.BlockSpec((tile_n, feat), lambda i: (i, 0)),
                  pl.BlockSpec((feat, out_pad), lambda i: (0, 0)),
                  pl.BlockSpec((1, out_pad), lambda i: (0, 0))],
        out_specs=pl.BlockSpec((tile_n, out_pad), lambda i: (i, 0)),
        compiler_params=pltpu.CompilerParams(
            dimension_semantics=("parallel",),
            vmem_limit_bytes=VMEM_LIMIT_BYTES),
    )(flat, w, b)
    return out[:N]


# ---------------------------------------------------------------------------
# Parameters: raw (PyTorch layout) + one-time preparation (fold / pack / cast)
# ---------------------------------------------------------------------------
def init_params(key, channels, code_dim, n_classes, img_size):
    ds = img_size // 2 ** 4
    feat = 128 * ds * ds
    blocks_cfg = [(channels, 16, False), (16, 32, True), (32, 64, True), (64, 128, True)]
    params = {"blocks": []}
    for (cin, cout, bn) in blocks_cfg:
        key, k1, k2 = jax.random.split(key, 3)
        w = jax.random.normal(k1, (cout, cin, 3, 3), jnp.float32) * 0.05
        b = jax.random.normal(k2, (cout,), jnp.float32) * 0.05
        if bn:
            gamma = jnp.ones((cout,), jnp.float32)
            beta = jnp.zeros((cout,), jnp.float32)
            running_mean = jnp.zeros((cout,), jnp.float32)
            running_var = jnp.ones((cout,), jnp.float32)
            scale = gamma / jnp.sqrt(running_var + BN_EPS)   # eval-mode BN
            shift = beta - running_mean * scale
        else:
            scale = jnp.ones((cout,), jnp.float32)
            shift = jnp.zeros((cout,), jnp.float32)
        params["blocks"].append((w, b, scale, shift))
    for name, out_dim in [("adv", 1), ("aux", n_classes), ("lat", code_dim)]:
        key, k1, k2 = jax.random.split(key, 3)
        params[name] = (
            jax.random.normal(k1, (out_dim, feat), jnp.float32) * 0.05,
            jax.random.normal(k2, (out_dim,), jnp.float32) * 0.05,
        )
    return params


def prepare_params(raw, *, n_classes, code_dim, img_size):
    """One-time layout work (hoisted out of the forward path)."""
    # (dh, ph) -> kh and (dw, pw) -> kw for the s2d tap decomposition of a
    # 3x3 / stride-2 / pad-1 conv; the (0, 0) s2d position is unused (zero weight).
    tap_of = {(0, 1): 0, (1, 0): 1, (1, 1): 2}

    prepared = {"blocks": []}
    for (w, b, scale, shift) in raw["blocks"]:
        # Fold BN scale into conv weights/bias:
        #   scale*lrelu(conv + b) + shift == lrelu(conv*scale + b*scale) + shift
        # Valid only for scale > 0 (true here: gamma=1, running_var=1).
        assert bool(jnp.all(scale > 0)), "BN-scale-into-weights fold needs scale > 0"
        cout, cin = w.shape[0], w.shape[1]
        w_f = w * scale[:, None, None, None]
        b_f = b * scale
        w_hw_io = jnp.transpose(w_f, (2, 3, 1, 0))           # (kh, kw, cin, cout)
        wtap = jnp.zeros((2, 2, 2, 2, cin, cout), jnp.float32)  # (dh, dw, ph, pw, ci, co)
        for (dh, ph), kh in tap_of.items():
            for (dw, pw), kw in tap_of.items():
                wtap = wtap.at[dh, dw, ph, pw].set(w_hw_io[kh, kw])
        wm = wtap.reshape(4, 4 * cin, cout)                   # tap idx = dh*2 + dw
        prepared["blocks"].append((wm.astype(jnp.bfloat16),
                                   b_f.reshape(1, cout).astype(jnp.float32),
                                   shift.reshape(1, cout).astype(jnp.float32)))

    ds = img_size // 2 ** 4
    feat = 128 * ds * ds

    def chw_to_hwc_cols(wh):  # permute head columns from (C,H,W) to (H,W,C) order
        o = wh.shape[0]
        return wh.reshape(o, 128, ds, ds).transpose(0, 2, 3, 1).reshape(o, feat)

    heads = [raw["adv"], raw["aux"], raw["lat"]]      # order: [adv | aux | latent]
    w_all = jnp.concatenate([chw_to_hwc_cols(w) for (w, _) in heads], axis=0)
    b_all = jnp.concatenate([b for (_, b) in heads], axis=0)
    total = w_all.shape[0]
    out_pad = ((total + 127) // 128) * 128            # pad to lane-dense 128 output
    w_pad = jnp.zeros((out_pad, feat), jnp.float32).at[:total].set(w_all)
    b_pad = jnp.zeros((out_pad,), jnp.float32).at[:total].set(b_all)
    prepared["head_w"] = w_pad.T.astype(jnp.bfloat16)         # (feat, out_pad)
    prepared["head_b"] = b_pad.reshape(1, out_pad).astype(jnp.float32)
    return prepared


# ---------------------------------------------------------------------------
# Forward
# ---------------------------------------------------------------------------
@functools.partial(jax.jit, static_argnames=("n_classes", "code_dim"))
def discriminator_forward(img_nchw, prepared, *, n_classes, code_dim):
    x = jnp.transpose(img_nchw, (0, 2, 3, 1)).astype(jnp.bfloat16)   # NCHW -> NHWC once
    for (wm, b2, shift2) in prepared["blocks"]:
        x = conv_block(x, wm, b2, shift2)
    flat = x.reshape(x.shape[0], -1)       # NHWC flatten; head columns pre-permuted
    out = heads_matmul(flat, prepared["head_w"], prepared["head_b"],
                       aux_start=1, aux_end=1 + n_classes)
    validity = out[:, 0:1]
    label = out[:, 1:1 + n_classes]
    latent_code = out[:, 1 + n_classes:1 + n_classes + code_dim]
    return validity, label, latent_code


def reference_forward(img_nchw, raw, *, n_classes, code_dim):
    """Independent XLA (lax.conv, raw PyTorch-layout weights, NCHW flatten)
    implementation used as an in-script numerical cross-check."""
    x = jnp.transpose(img_nchw, (0, 2, 3, 1)).astype(jnp.bfloat16)
    for (w, b, scale, shift) in raw["blocks"]:
        cout = w.shape[0]
        w_f = w * scale[:, None, None, None]
        b_f = b * scale
        w_hwio = jnp.transpose(w_f, (2, 3, 1, 0)).astype(jnp.bfloat16)
        y = jax.lax.conv_general_dilated(
            x, w_hwio, window_strides=(2, 2), padding=((1, 1), (1, 1)),
            dimension_numbers=("NHWC", "HWIO", "NHWC"),
            preferred_element_type=jnp.float32)
        y = y + b_f.reshape(1, 1, 1, cout)
        y = jnp.where(y > 0, y, LRELU_SLOPE * y)
        y = y + shift.reshape(1, 1, 1, cout)
        x = y.astype(jnp.bfloat16)
    flat = jnp.transpose(x, (0, 3, 1, 2)).reshape(x.shape[0], -1)   # PyTorch (C,H,W) flatten
    def head(name):
        w, b = raw[name]
        return jnp.dot(flat, w.T.astype(jnp.bfloat16),
                       preferred_element_type=jnp.float32) + b
    validity = head("adv")
    label = jax.nn.softmax(head("aux"), axis=-1)
    latent_code = head("lat")
    return validity, label, latent_code


if __name__ == "__main__":
    channels, code_dim, n_classes, img_size = 3, 2, 10, 32
    batch = 3

    key = jax.random.PRNGKey(0)
    k_img, k_param = jax.random.split(key)
    img = jax.random.normal(k_img, (batch, channels, img_size, img_size), jnp.float32)

    raw = init_params(k_param, channels, code_dim, n_classes, img_size)
    prepared = prepare_params(raw, n_classes=n_classes, code_dim=code_dim,
                              img_size=img_size)

    validity, label, latent_code = discriminator_forward(
        img, prepared, n_classes=n_classes, code_dim=code_dim)
    jax.block_until_ready((validity, label, latent_code))

    assert validity.shape == (batch, 1)
    assert label.shape == (batch, n_classes)
    assert latent_code.shape == (batch, code_dim)
    assert bool(jnp.allclose(jnp.sum(label, axis=-1), 1.0, atol=1e-4))

    # Cross-check against an independent XLA implementation built from the RAW
    # (PyTorch-layout) parameters -- validates tap packing + head permutation.
    v_ref, l_ref, c_ref = reference_forward(img, raw, n_classes=n_classes,
                                            code_dim=code_dim)
    assert bool(jnp.allclose(validity, v_ref, atol=2e-2, rtol=2e-2))
    assert bool(jnp.allclose(label, l_ref, atol=2e-2, rtol=2e-2))
    assert bool(jnp.allclose(latent_code, c_ref, atol=2e-2, rtol=2e-2))

    print("KERNEL_OK")
</pallas_src>

<mosaic_0001>
module attributes {stable_mosaic.version = 11 : i64} {
  func.func @_conv_block_kernel(%arg0: i32, %arg1: memref<1x272x12xbf16, #tpu.memory_space<vmem>>, %arg2: memref<1x272x12xbf16, #tpu.memory_space<vmem>>, %arg3: memref<4x12x16xbf16, #tpu.memory_space<vmem>>, %arg4: memref<1x16xf32, #tpu.memory_space<vmem>>, %arg5: memref<1x16xf32, #tpu.memory_space<vmem>>, %arg6: memref<1x256x16xbf16, #tpu.memory_space<vmem>>) attributes {dimension_semantics = [#tpu.dimension_semantics<parallel>], iteration_bounds = array<i64: 3>, scalar_prefetch = 0 : i64, scratch_operands = 0 : i64, tpu.core_type = #tpu.core_type<tc>, window_params = [{transform_indices = @transform_0, window_bounds = array<i64: 1, 272, 12>}, {transform_indices = @transform_1, window_bounds = array<i64: 1, 272, 12>}, {pipeline_mode = #tpu.pipeline_mode<synchronous>, transform_indices = @transform_2, window_bounds = array<i64: 4, 12, 16>}, {pipeline_mode = #tpu.pipeline_mode<synchronous>, transform_indices = @transform_3, window_bounds = array<i64: 1, 16>}, {pipeline_mode = #tpu.pipeline_mode<synchronous>, transform_indices = @transform_4, window_bounds = array<i64: 1, 16>}, {transform_indices = @transform_5, window_bounds = array<i64: 1, 256, 16>}]} {
    %c0 = arith.constant 0 : index
    %c0_0 = arith.constant 0 : index
    %c0_1 = arith.constant 0 : index
    %0 = vector.load %arg1[%c0, %c0_0, %c0_1] : memref<1x272x12xbf16, #tpu.memory_space<vmem>>, vector<1x256x12xbf16>
    %1 = vector.shape_cast %0 : vector<1x256x12xbf16> to vector<256x12xbf16>
    %c0_2 = arith.constant 0 : index
    %c0_3 = arith.constant 0 : index
    %c0_4 = arith.constant 0 : index
    %2 = vector.load %arg3[%c0_2, %c0_3, %c0_4] : memref<4x12x16xbf16, #tpu.memory_space<vmem>>, vector<1x12x16xbf16>
    %3 = vector.shape_cast %2 : vector<1x12x16xbf16> to vector<12x16xbf16>
    %cst = arith.constant dense<0.000000e+00> : vector<256x16xf32>
    %4 = tpu.matmul %1, %3, %cst {dimension_numbers = #tpu.dot_dimension_numbers<[1], [0], [0], [1], [0, 0, 1, 1], [], []>} : vector<256x12xbf16>, vector<12x16xbf16>, vector<256x16xf32> -> vector<256x16xf32>
    %c0_5 = arith.constant 0 : index
    %c0_6 = arith.constant 0 : index
    %c0_7 = arith.constant 0 : index
    %5 = vector.load %arg2[%c0_5, %c0_6, %c0_7] : memref<1x272x12xbf16, #tpu.memory_space<vmem>>, vector<1x256x12xbf16>
    %6 = vector.shape_cast %5 : vector<1x256x12xbf16> to vector<256x12xbf16>
    %c1 = arith.constant 1 : index
    %c0_8 = arith.constant 0 : index
    %c0_9 = arith.constant 0 : index
    %7 = vector.load %arg3[%c1, %c0_8, %c0_9] : memref<4x12x16xbf16, #tpu.memory_space<vmem>>, vector<1x12x16xbf16>
    %8 = vector.shape_cast %7 : vector<1x12x16xbf16> to vector<12x16xbf16>
    %cst_10 = arith.constant dense<0.000000e+00> : vector<256x16xf32>
    %9 = tpu.matmul %6, %8, %cst_10 {dimension_numbers = #tpu.dot_dimension_numbers<[1], [0], [0], [1], [0, 0, 1, 1], [], []>} : vector<256x12xbf16>, vector<12x16xbf16>, vector<256x16xf32> -> vector<256x16xf32>
    %10 = arith.addf %4, %9 : vector<256x16xf32>
    %c0_11 = arith.constant 0 : index
    %c16 = arith.constant 16 : index
    %c0_12 = arith.constant 0 : index
    %11 = vector.load %arg1[%c0_11, %c16, %c0_12] : memref<1x272x12xbf16, #tpu.memory_space<vmem>>, vector<1x256x12xbf16>
    %12 = vector.shape_cast %11 : vector<1x256x12xbf16> to vector<256x12xbf16>
    %c2 = arith.constant 2 : index
    %c0_13 = arith.constant 0 : index
    %c0_14 = arith.constant 0 : index
    %13 = vector.load %arg3[%c2, %c0_13, %c0_14] : memref<4x12x16xbf16, #tpu.memory_space<vmem>>, vector<1x12x16xbf16>
    %14 = vector.shape_cast %13 : vector<1x12x16xbf16> to vector<12x16xbf16>
    %cst_15 = arith.constant dense<0.000000e+00> : vector<256x16xf32>
    %15 = tpu.matmul %12, %14, %cst_15 {dimension_numbers = #tpu.dot_dimension_numbers<[1], [0], [0], [1], [0, 0, 1, 1], [], []>} : vector<256x12xbf16>, vector<12x16xbf16>, vector<256x16xf32> -> vector<256x16xf32>
    %16 = arith.addf %10, %15 : vector<256x16xf32>
    %c0_16 = arith.constant 0 : index
    %c16_17 = arith.constant 16 : index
    %c0_18 = arith.constant 0 : index
    %17 = vector.load %arg2[%c0_16, %c16_17, %c0_18] : memref<1x272x12xbf16, #tpu.memory_space<vmem>>, vector<1x256x12xbf16>
    %18 = vector.shape_cast %17 : vector<1x256x12xbf16> to vector<256x12xbf16>
    %c3 = arith.constant 3 : index
    %c0_19 = arith.constant 0 : index
    %c0_20 = arith.constant 0 : index
    %19 = vector.load %arg3[%c3, %c0_19, %c0_20] : memref<4x12x16xbf16, #tpu.memory_space<vmem>>, vector<1x12x16xbf16>
    %20 = vector.shape_cast %19 : vector<1x12x16xbf16> to vector<12x16xbf16>
    %cst_21 = arith.constant dense<0.000000e+00> : vector<256x16xf32>
    %21 = tpu.matmul %18, %20, %cst_21 {dimension_numbers = #tpu.dot_dimension_numbers<[1], [0], [0], [1], [0, 0, 1, 1], [], []>} : vector<256x12xbf16>, vector<12x16xbf16>, vector<256x16xf32> -> vector<256x16xf32>
    %22 = arith.addf %16, %21 : vector<256x16xf32>
    %c0_22 = arith.constant 0 : index
    %c0_23 = arith.constant 0 : index
    %23 = vector.load %arg4[%c0_22, %c0_23] : memref<1x16xf32, #tpu.memory_space<vmem>>, vector<1x16xf32>
    %24 = vector.broadcast %23 : vector<1x16xf32> to vector<256x16xf32>
    %25 = arith.addf %22, %24 : vector<256x16xf32>
    %cst_24 = arith.constant 0.000000e+00 : f32
    %26 = vector.broadcast %cst_24 : f32 to vector<256x16xf32>
    %27 = arith.cmpf ogt, %25, %26 : vector<256x16xf32>
    %cst_25 = arith.constant 2.000000e-01 : f32
    %28 = vector.broadcast %cst_25 : f32 to vector<256x16xf32>
    %29 = arith.mulf %28, %25 : vector<256x16xf32>
    %30 = arith.select %27, %25, %29 : vector<256x16xi1>, vector<256x16xf32>
    %c0_26 = arith.constant 0 : index
    %c0_27 = arith.constant 0 : index
    %31 = vector.load %arg5[%c0_26, %c0_27] : memref<1x16xf32, #tpu.memory_space<vmem>>, vector<1x16xf32>
    %32 = vector.broadcast %31 : vector<1x16xf32> to vector<256x16xf32>
    %33 = arith.addf %30, %32 : vector<256x16xf32>
    %34 = arith.truncf %33 : vector<256x16xf32> to vector<256x16xbf16>
    %c0_28 = arith.constant 0 : index
    %c0_29 = arith.constant 0 : index
    %c0_30 = arith.constant 0 : index
    %35 = vector.load %arg6[%c0_28, %c0_29, %c0_30] : memref<1x256x16xbf16, #tpu.memory_space<vmem>>, vector<1x256x16xbf16>
    %36 = vector.shape_cast %35 : vector<1x256x16xbf16> to vector<256x16xbf16>
    %37 = vector.shape_cast %34 : vector<256x16xbf16> to vector<1x256x16xbf16>
    tpu.vector_store %arg6[%c0_28, %c0_29, %c0_30], %37 {strides = array<i32>} : memref<1x256x16xbf16, #tpu.memory_space<vmem>>, vector<1x256x16xbf16>,
    return
  }
  func.func @transform_0(%arg0: i32) -> (i32, i32, i32) {
    %c0_i32 = arith.constant 0 : i32
    %c0_i32_0 = arith.constant 0 : i32
    %c0_i32_1 = arith.constant 0 : i32
    return %arg0, %c0_i32, %c0_i32_0 : i32, i32, i32
  }
  func.func @transform_1(%arg0: i32) -> (i32, i32, i32) {
    %c0_i32 = arith.constant 0 : i32
    %c0_i32_0 = arith.constant 0 : i32
    %c0_i32_1 = arith.constant 0 : i32
    return %arg0, %c0_i32, %c0_i32_0 : i32, i32, i32
  }
  func.func @transform_2(%arg0: i32) -> (i32, i32, i32) {
    %c0_i32 = arith.constant 0 : i32
    %c0_i32_0 = arith.constant 0 : i32
    %c0_i32_1 = arith.constant 0 : i32
    %c0_i32_2 = arith.constant 0 : i32
    return %c0_i32, %c0_i32_0, %c0_i32_1 : i32, i32, i32
  }
  func.func @transform_3(%arg0: i32) -> (i32, i32) {
    %c0_i32 = arith.constant 0 : i32
    %c0_i32_0 = arith.constant 0 : i32
    %c0_i32_1 = arith.constant 0 : i32
    return %c0_i32, %c0_i32_0 : i32, i32
  }
  func.func @transform_4(%arg0: i32) -> (i32, i32) {
    %c0_i32 = arith.constant 0 : i32
    %c0_i32_0 = arith.constant 0 : i32
    %c0_i32_1 = arith.constant 0 : i32
    return %c0_i32, %c0_i32_0 : i32, i32
  }
  func.func @transform_5(%arg0: i32) -> (i32, i32, i32) {
    %c0_i32 = arith.constant 0 : i32
    %c0_i32_0 = arith.constant 0 : i32
    %c0_i32_1 = arith.constant 0 : i32
    return %arg0, %c0_i32, %c0_i32_0 : i32, i32, i32
  }
}

module attributes {stable_mosaic.version = 11 : i64} {
  func.func @_conv_block_kernel(%arg0: i32, %arg1: memref<1x72x64xbf16, #tpu.memory_space<vmem>>, %arg2: memref<1x72x64xbf16, #tpu.memory_space<vmem>>, %arg3: memref<4x64x32xbf16, #tpu.memory_space<vmem>>, %arg4: memref<1x32xf32, #tpu.memory_space<vmem>>, %arg5: memref<1x32xf32, #tpu.memory_space<vmem>>, %arg6: memref<1x64x32xbf16, #tpu.memory_space<vmem>>) attributes {dimension_semantics = [#tpu.dimension_semantics<parallel>], iteration_bounds = array<i64: 3>, scalar_prefetch = 0 : i64, scratch_operands = 0 : i64, tpu.core_type = #tpu.core_type<tc>, window_params = [{transform_indices = @transform_0, window_bounds = array<i64: 1, 72, 64>}, {transform_indices = @transform_1, window_bounds = array<i64: 1, 72, 64>}, {pipeline_mode = #tpu.pipeline_mode<synchronous>, transform_indices = @transform_2, window_bounds = array<i64: 4, 64, 32>}, {pipeline_mode = #tpu.pipeline_mode<synchronous>, transform_indices = @transform_3, window_bounds = array<i64: 1, 32>}, {pipeline_mode = #tpu.pipeline_mode<synchronous>, transform_indices = @transform_4, window_bounds = array<i64: 1, 32>}, {transform_indices = @transform_5, window_bounds = array<i64: 1, 64, 32>}]} {
    %c0 = arith.constant 0 : index
    %c0_0 = arith.constant 0 : index
    %c0_1 = arith.constant 0 : index
    %0 = vector.load %arg1[%c0, %c0_0, %c0_1] : memref<1x72x64xbf16, #tpu.memory_space<vmem>>, vector<1x64x64xbf16>
    %1 = vector.shape_cast %0 : vector<1x64x64xbf16> to vector<64x64xbf16>
    %c0_2 = arith.constant 0 : index
    %c0_3 = arith.constant 0 : index
    %c0_4 = arith.constant 0 : index
    %2 = vector.load %arg3[%c0_2, %c0_3, %c0_4] : memref<4x64x32xbf16, #tpu.memory_space<vmem>>, vector<1x64x32xbf16>
    %3 = vector.shape_cast %2 : vector<1x64x32xbf16> to vector<64x32xbf16>
    %cst = arith.constant dense<0.000000e+00> : vector<64x32xf32>
    %4 = tpu.matmul %1, %3, %cst {dimension_numbers = #tpu.dot_dimension_numbers<[1], [0], [0], [1], [0, 0, 1, 1], [], []>} : vector<64x64xbf16>, vector<64x32xbf16>, vector<64x32xf32> -> vector<64x32xf32>
    %c0_5 = arith.constant 0 : index
    %c0_6 = arith.constant 0 : index
    %c0_7 = arith.constant 0 : index
    %5 = vector.load %arg2[%c0_5, %c0_6, %c0_7] : memref<1x72x64xbf16, #tpu.memory_space<vmem>>, vector<1x64x64xbf16>
    %6 = vector.shape_cast %5 : vector<1x64x64xbf16> to vector<64x64xbf16>
    %c1 = arith.constant 1 : index
    %c0_8 = arith.constant 0 : index
    %c0_9 = arith.constant 0 : index
    %7 = vector.load %arg3[%c1, %c0_8, %c0_9] : memref<4x64x32xbf16, #tpu.memory_space<vmem>>, vector<1x64x32xbf16>
    %8 = vector.shape_cast %7 : vector<1x64x32xbf16> to vector<64x32xbf16>
    %cst_10 = arith.constant dense<0.000000e+00> : vector<64x32xf32>
    %9 = tpu.matmul %6, %8, %cst_10 {dimension_numbers = #tpu.dot_dimension_numbers<[1], [0], [0], [1], [0, 0, 1, 1], [], []>} : vector<64x64xbf16>, vector<64x32xbf16>, vector<64x32xf32> -> vector<64x32xf32>
    %10 = arith.addf %4, %9 : vector<64x32xf32>
    %c0_11 = arith.constant 0 : index
    %c8 = arith.constant 8 : index
    %c0_12 = arith.constant 0 : index
    %11 = vector.load %arg1[%c0_11, %c8, %c0_12] : memref<1x72x64xbf16, #tpu.memory_space<vmem>>, vector<1x64x64xbf16>
    %12 = vector.shape_cast %11 : vector<1x64x64xbf16> to vector<64x64xbf16>
    %c2 = arith.constant 2 : index
    %c0_13 = arith.constant 0 : index
    %c0_14 = arith.constant 0 : index
    %13 = vector.load %arg3[%c2, %c0_13, %c0_14] : memref<4x64x32xbf16, #tpu.memory_space<vmem>>, vector<1x64x32xbf16>
    %14 = vector.shape_cast %13 : vector<1x64x32xbf16> to vector<64x32xbf16>
    %cst_15 = arith.constant dense<0.000000e+00> : vector<64x32xf32>
    %15 = tpu.matmul %12, %14, %cst_15 {dimension_numbers = #tpu.dot_dimension_numbers<[1], [0], [0], [1], [0, 0, 1, 1], [], []>} : vector<64x64xbf16>, vector<64x32xbf16>, vector<64x32xf32> -> vector<64x32xf32>
    %16 = arith.addf %10, %15 : vector<64x32xf32>
    %c0_16 = arith.constant 0 : index
    %c8_17 = arith.constant 8 : index
    %c0_18 = arith.constant 0 : index
    %17 = vector.load %arg2[%c0_16, %c8_17, %c0_18] : memref<1x72x64xbf16, #tpu.memory_space<vmem>>, vector<1x64x64xbf16>
    %18 = vector.shape_cast %17 : vector<1x64x64xbf16> to vector<64x64xbf16>
    %c3 = arith.constant 3 : index
    %c0_19 = arith.constant 0 : index
    %c0_20 = arith.constant 0 : index
    %19 = vector.load %arg3[%c3, %c0_19, %c0_20] : memref<4x64x32xbf16, #tpu.memory_space<vmem>>, vector<1x64x32xbf16>
    %20 = vector.shape_cast %19 : vector<1x64x32xbf16> to vector<64x32xbf16>
    %cst_21 = arith.constant dense<0.000000e+00> : vector<64x32xf32>
    %21 = tpu.matmul %18, %20, %cst_21 {dimension_numbers = #tpu.dot_dimension_numbers<[1], [0], [0], [1], [0, 0, 1, 1], [], []>} : vector<64x64xbf16>, vector<64x32xbf16>, vector<64x32xf32> -> vector<64x32xf32>
    %22 = arith.addf %16, %21 : vector<64x32xf32>
    %c0_22 = arith.constant 0 : index
    %c0_23 = arith.constant 0 : index
    %23 = vector.load %arg4[%c0_22, %c0_23] : memref<1x32xf32, #tpu.memory_space<vmem>>, vector<1x32xf32>
    %24 = vector.broadcast %23 : vector<1x32xf32> to vector<64x32xf32>
    %25 = arith.addf %22, %24 : vector<64x32xf32>
    %cst_24 = arith.constant 0.000000e+00 : f32
    %26 = vector.broadcast %cst_24 : f32 to vector<64x32xf32>
    %27 = arith.cmpf ogt, %25, %26 : vector<64x32xf32>
    %cst_25 = arith.constant 2.000000e-01 : f32
    %28 = vector.broadcast %cst_25 : f32 to vector<64x32xf32>
    %29 = arith.mulf %28, %25 : vector<64x32xf32>
    %30 = arith.select %27, %25, %29 : vector<64x32xi1>, vector<64x32xf32>
    %c0_26 = arith.constant 0 : index
    %c0_27 = arith.constant 0 : index
    %31 = vector.load %arg5[%c0_26, %c0_27] : memref<1x32xf32, #tpu.memory_space<vmem>>, vector<1x32xf32>
    %32 = vector.broadcast %31 : vector<1x32xf32> to vector<64x32xf32>
    %33 = arith.addf %30, %32 : vector<64x32xf32>
    %34 = arith.truncf %33 : vector<64x32xf32> to vector<64x32xbf16>
    %c0_28 = arith.constant 0 : index
    %c0_29 = arith.constant 0 : index
    %c0_30 = arith.constant 0 : index
    %35 = vector.load %arg6[%c0_28, %c0_29, %c0_30] : memref<1x64x32xbf16, #tpu.memory_space<vmem>>, vector<1x64x32xbf16>
    %36 = vector.shape_cast %35 : vector<1x64x32xbf16> to vector<64x32xbf16>
    %37 = vector.shape_cast %34 : vector<64x32xbf16> to vector<1x64x32xbf16>
    tpu.vector_store %arg6[%c0_28, %c0_29, %c0_30], %37 {strides = array<i32>} : memref<1x64x32xbf16, #tpu.memory_space<vmem>>, vector<1x64x32xbf16>,
    return
  }
  func.func @transform_0(%arg0: i32) -> (i32, i32, i32) {
    %c0_i32 = arith.constant 0 : i32
    %c0_i32_0 = arith.constant 0 : i32
    %c0_i32_1 = arith.constant 0 : i32
    return %arg0, %c0_i32, %c0_i32_0 : i32, i32, i32
  }
  func.func @transform_1(%arg0: i32) -> (i32, i32, i32) {
    %c0_i32 = arith.constant 0 : i32
    %c0_i32_0 = arith.constant 0 : i32
    %c0_i32_1 = arith.constant 0 : i32
    return %arg0, %c0_i32, %c0_i32_0 : i32, i32, i32
  }
  func.func @transform_2(%arg0: i32) -> (i32, i32, i32) {
    %c0_i32 = arith.constant 0 : i32
    %c0_i32_0 = arith.constant 0 : i32
    %c0_i32_1 = arith.constant 0 : i32
    %c0_i32_2 = arith.constant 0 : i32
    return %c0_i32, %c0_i32_0, %c0_i32_1 : i32, i32, i32
  }
  func.func @transform_3(%arg0: i32) -> (i32, i32) {
    %c0_i32 = arith.constant 0 : i32
    %c0_i32_0 = arith.constant 0 : i32
    %c0_i32_1 = arith.constant 0 : i32
    return %c0_i32, %c0_i32_0 : i32, i32
  }
  func.func @transform_4(%arg0: i32) -> (i32, i32) {
    %c0_i32 = arith.constant 0 : i32
    %c0_i32_0 = arith.constant 0 : i32
    %c0_i32_1 = arith.constant 0 : i32
    return %c0_i32, %c0_i32_0 : i32, i32
  }
  func.func @transform_5(%arg0: i32) -> (i32, i32, i32) {
    %c0_i32 = arith.constant 0 : i32
    %c0_i32_0 = arith.constant 0 : i32
    %c0_i32_1 = arith.constant 0 : i32
    return %arg0, %c0_i32, %c0_i32_0 : i32, i32, i32
  }
}

module attributes {stable_mosaic.version = 11 : i64} {
  func.func @_conv_block_kernel(%arg0: i32, %arg1: memref<1x20x128xbf16, #tpu.memory_space<vmem>>, %arg2: memref<1x20x128xbf16, #tpu.memory_space<vmem>>, %arg3: memref<4x128x64xbf16, #tpu.memory_space<vmem>>, %arg4: memref<1x64xf32, #tpu.memory_space<vmem>>, %arg5: memref<1x64xf32, #tpu.memory_space<vmem>>, %arg6: memref<1x16x64xbf16, #tpu.memory_space<vmem>>) attributes {dimension_semantics = [#tpu.dimension_semantics<parallel>], iteration_bounds = array<i64: 3>, scalar_prefetch = 0 : i64, scratch_operands = 0 : i64, tpu.core_type = #tpu.core_type<tc>, window_params = [{transform_indices = @transform_0, window_bounds = array<i64: 1, 20, 128>}, {transform_indices = @transform_1, window_bounds = array<i64: 1, 20, 128>}, {pipeline_mode = #tpu.pipeline_mode<synchronous>, transform_indices = @transform_2, window_bounds = array<i64: 4, 128, 64>}, {pipeline_mode = #tpu.pipeline_mode<synchronous>, transform_indices = @transform_3, window_bounds = array<i64: 1, 64>}, {pipeline_mode = #tpu.pipeline_mode<synchronous>, transform_indices = @transform_4, window_bounds = array<i64: 1, 64>}, {transform_indices = @transform_5, window_bounds = array<i64: 1, 16, 64>}]} {
    %c0 = arith.constant 0 : index
    %c0_0 = arith.constant 0 : index
    %c0_1 = arith.constant 0 : index
    %0 = vector.load %arg1[%c0, %c0_0, %c0_1] : memref<1x20x128xbf16, #tpu.memory_space<vmem>>, vector<1x16x128xbf16>
    %1 = vector.shape_cast %0 : vector<1x16x128xbf16> to vector<16x128xbf16>
    %c0_2 = arith.constant 0 : index
    %c0_3 = arith.constant 0 : index
    %c0_4 = arith.constant 0 : index
    %2 = vector.load %arg3[%c0_2, %c0_3, %c0_4] : memref<4x128x64xbf16, #tpu.memory_space<vmem>>, vector<1x128x64xbf16>
    %3 = vector.shape_cast %2 : vector<1x128x64xbf16> to vector<128x64xbf16>
    %cst = arith.constant dense<0.000000e+00> : vector<16x64xf32>
    %4 = tpu.matmul %1, %3, %cst {dimension_numbers = #tpu.dot_dimension_numbers<[1], [0], [0], [1], [0, 0, 1, 1], [], []>} : vector<16x128xbf16>, vector<128x64xbf16>, vector<16x64xf32> -> vector<16x64xf32>
    %c0_5 = arith.constant 0 : index
    %c0_6 = arith.constant 0 : index
    %c0_7 = arith.constant 0 : index
    %5 = vector.load %arg2[%c0_5, %c0_6, %c0_7] : memref<1x20x128xbf16, #tpu.memory_space<vmem>>, vector<1x16x128xbf16>
    %6 = vector.shape_cast %5 : vector<1x16x128xbf16> to vector<16x128xbf16>
    %c1 = arith.constant 1 : index
    %c0_8 = arith.constant 0 : index
    %c0_9 = arith.constant 0 : index
    %7 = vector.load %arg3[%c1, %c0_8, %c0_9] : memref<4x128x64xbf16, #tpu.memory_space<vmem>>, vector<1x128x64xbf16>
    %8 = vector.shape_cast %7 : vector<1x128x64xbf16> to vector<128x64xbf16>
    %cst_10 = arith.constant dense<0.000000e+00> : vector<16x64xf32>
    %9 = tpu.matmul %6, %8, %cst_10 {dimension_numbers = #tpu.dot_dimension_numbers<[1], [0], [0], [1], [0, 0, 1, 1], [], []>} : vector<16x128xbf16>, vector<128x64xbf16>, vector<16x64xf32> -> vector<16x64xf32>
    %10 = arith.addf %4, %9 : vector<16x64xf32>
    %c0_11 = arith.constant 0 : index
    %c4 = arith.constant 4 : index
    %c0_12 = arith.constant 0 : index
    %11 = vector.load %arg1[%c0_11, %c4, %c0_12] : memref<1x20x128xbf16, #tpu.memory_space<vmem>>, vector<1x16x128xbf16>
    %12 = vector.shape_cast %11 : vector<1x16x128xbf16> to vector<16x128xbf16>
    %c2 = arith.constant 2 : index
    %c0_13 = arith.constant 0 : index
    %c0_14 = arith.constant 0 : index
    %13 = vector.load %arg3[%c2, %c0_13, %c0_14] : memref<4x128x64xbf16, #tpu.memory_space<vmem>>, vector<1x128x64xbf16>
    %14 = vector.shape_cast %13 : vector<1x128x64xbf16> to vector<128x64xbf16>
    %cst_15 = arith.constant dense<0.000000e+00> : vector<16x64xf32>
    %15 = tpu.matmul %12, %14, %cst_15 {dimension_numbers = #tpu.dot_dimension_numbers<[1], [0], [0], [1], [0, 0, 1, 1], [], []>} : vector<16x128xbf16>, vector<128x64xbf16>, vector<16x64xf32> -> vector<16x64xf32>
    %16 = arith.addf %10, %15 : vector<16x64xf32>
    %c0_16 = arith.constant 0 : index
    %c4_17 = arith.constant 4 : index
    %c0_18 = arith.constant 0 : index
    %17 = vector.load %arg2[%c0_16, %c4_17, %c0_18] : memref<1x20x128xbf16, #tpu.memory_space<vmem>>, vector<1x16x128xbf16>
    %18 = vector.shape_cast %17 : vector<1x16x128xbf16> to vector<16x128xbf16>
    %c3 = arith.constant 3 : index
    %c0_19 = arith.constant 0 : index
    %c0_20 = arith.constant 0 : index
    %19 = vector.load %arg3[%c3, %c0_19, %c0_20] : memref<4x128x64xbf16, #tpu.memory_space<vmem>>, vector<1x128x64xbf16>
    %20 = vector.shape_cast %19 : vector<1x128x64xbf16> to vector<128x64xbf16>
    %cst_21 = arith.constant dense<0.000000e+00> : vector<16x64xf32>
    %21 = tpu.matmul %18, %20, %cst_21 {dimension_numbers = #tpu.dot_dimension_numbers<[1], [0], [0], [1], [0, 0, 1, 1], [], []>} : vector<16x128xbf16>, vector<128x64xbf16>, vector<16x64xf32> -> vector<16x64xf32>
    %22 = arith.addf %16, %21 : vector<16x64xf32>
    %c0_22 = arith.constant 0 : index
    %c0_23 = arith.constant 0 : index
    %23 = vector.load %arg4[%c0_22, %c0_23] : memref<1x64xf32, #tpu.memory_space<vmem>>, vector<1x64xf32>
    %24 = vector.broadcast %23 : vector<1x64xf32> to vector<16x64xf32>
    %25 = arith.addf %22, %24 : vector<16x64xf32>
    %cst_24 = arith.constant 0.000000e+00 : f32
    %26 = vector.broadcast %cst_24 : f32 to vector<16x64xf32>
    %27 = arith.cmpf ogt, %25, %26 : vector<16x64xf32>
    %cst_25 = arith.constant 2.000000e-01 : f32
    %28 = vector.broadcast %cst_25 : f32 to vector<16x64xf32>
    %29 = arith.mulf %28, %25 : vector<16x64xf32>
    %30 = arith.select %27, %25, %29 : vector<16x64xi1>, vector<16x64xf32>
    %c0_26 = arith.constant 0 : index
    %c0_27 = arith.constant 0 : index
    %31 = vector.load %arg5[%c0_26, %c0_27] : memref<1x64xf32, #tpu.memory_space<vmem>>, vector<1x64xf32>
    %32 = vector.broadcast %31 : vector<1x64xf32> to vector<16x64xf32>
    %33 = arith.addf %30, %32 : vector<16x64xf32>
    %34 = arith.truncf %33 : vector<16x64xf32> to vector<16x64xbf16>
    %c0_28 = arith.constant 0 : index
    %c0_29 = arith.constant 0 : index
    %c0_30 = arith.constant 0 : index
    %35 = vector.load %arg6[%c0_28, %c0_29, %c0_30] : memref<1x16x64xbf16, #tpu.memory_space<vmem>>, vector<1x16x64xbf16>
    %36 = vector.shape_cast %35 : vector<1x16x64xbf16> to vector<16x64xbf16>
    %37 = vector.shape_cast %34 : vector<16x64xbf16> to vector<1x16x64xbf16>
    tpu.vector_store %arg6[%c0_28, %c0_29, %c0_30], %37 {strides = array<i32>} : memref<1x16x64xbf16, #tpu.memory_space<vmem>>, vector<1x16x64xbf16>,
    return
  }
  func.func @transform_0(%arg0: i32) -> (i32, i32, i32) {
    %c0_i32 = arith.constant 0 : i32
    %c0_i32_0 = arith.constant 0 : i32
    %c0_i32_1 = arith.constant 0 : i32
    return %arg0, %c0_i32, %c0_i32_0 : i32, i32, i32
  }
  func.func @transform_1(%arg0: i32) -> (i32, i32, i32) {
    %c0_i32 = arith.constant 0 : i32
    %c0_i32_0 = arith.constant 0 : i32
    %c0_i32_1 = arith.constant 0 : i32
    return %arg0, %c0_i32, %c0_i32_0 : i32, i32, i32
  }
  func.func @transform_2(%arg0: i32) -> (i32, i32, i32) {
    %c0_i32 = arith.constant 0 : i32
    %c0_i32_0 = arith.constant 0 : i32
    %c0_i32_1 = arith.constant 0 : i32
    %c0_i32_2 = arith.constant 0 : i32
    return %c0_i32, %c0_i32_0, %c0_i32_1 : i32, i32, i32
  }
  func.func @transform_3(%arg0: i32) -> (i32, i32) {
    %c0_i32 = arith.constant 0 : i32
    %c0_i32_0 = arith.constant 0 : i32
    %c0_i32_1 = arith.constant 0 : i32
    return %c0_i32, %c0_i32_0 : i32, i32
  }
  func.func @transform_4(%arg0: i32) -> (i32, i32) {
    %c0_i32 = arith.constant 0 : i32
    %c0_i32_0 = arith.constant 0 : i32
    %c0_i32_1 = arith.constant 0 : i32
    return %c0_i32, %c0_i32_0 : i32, i32
  }
  func.func @transform_5(%arg0: i32) -> (i32, i32, i32) {
    %c0_i32 = arith.constant 0 : i32
    %c0_i32_0 = arith.constant 0 : i32
    %c0_i32_1 = arith.constant 0 : i32
    return %arg0, %c0_i32, %c0_i32_0 : i32, i32, i32
  }
}

module attributes {stable_mosaic.version = 11 : i64} {
  func.func @_heads_kernel(%arg0: i32, %arg1: memref<3x512xbf16, #tpu.memory_space<vmem>>, %arg2: memref<512x128xbf16, #tpu.memory_space<vmem>>, %arg3: memref<1x128xf32, #tpu.memory_space<vmem>>, %arg4: memref<3x128xf32, #tpu.memory_space<vmem>>) attributes {dimension_semantics = [#tpu.dimension_semantics<parallel>], iteration_bounds = array<i64: 1>, scalar_prefetch = 0 : i64, scratch_operands = 0 : i64, tpu.core_type = #tpu.core_type<tc>, window_params = [{transform_indices = @transform_0, window_bounds = array<i64: 3, 512>}, {pipeline_mode = #tpu.pipeline_mode<synchronous>, transform_indices = @transform_1, window_bounds = array<i64: 512, 128>}, {pipeline_mode = #tpu.pipeline_mode<synchronous>, transform_indices = @transform_2, window_bounds = array<i64: 1, 128>}, {transform_indices = @transform_3, window_bounds = array<i64: 3, 128>}]} {
    %c0 = arith.constant 0 : index
    %c0_0 = arith.constant 0 : index
    %0 = vector.load %arg1[%c0, %c0_0] : memref<3x512xbf16, #tpu.memory_space<vmem>>, vector<3x512xbf16>
    %c0_1 = arith.constant 0 : index
    %c0_2 = arith.constant 0 : index
    %1 = vector.load %arg2[%c0_1, %c0_2] : memref<512x128xbf16, #tpu.memory_space<vmem>>, vector<512x128xbf16>
    %cst = arith.constant dense<0.000000e+00> : vector<3x128xf32>
    %2 = tpu.matmul %0, %1, %cst {dimension_numbers = #tpu.dot_dimension_numbers<[1], [0], [0], [1], [0, 0, 1, 1], [], []>} : vector<3x512xbf16>, vector<512x128xbf16>, vector<3x128xf32> -> vector<3x128xf32>
    %c0_3 = arith.constant 0 : index
    %c0_4 = arith.constant 0 : index
    %3 = vector.load %arg3[%c0_3, %c0_4] : memref<1x128xf32, #tpu.memory_space<vmem>>, vector<1x128xf32>
    %4 = vector.broadcast %3 : vector<1x128xf32> to vector<3x128xf32>
    %5 = arith.addf %2, %4 : vector<3x128xf32>
    %6 = tpu.iota {dimensions = array<i32: 1>} : vector<3x128xi32>
    %c1_i32 = arith.constant 1 : i32
    %7 = vector.broadcast %c1_i32 : i32 to vector<3x128xi32>
    %8 = arith.cmpi sge, %6, %7 : vector<3x128xi32>
    %c11_i32 = arith.constant 11 : i32
    %9 = vector.broadcast %c11_i32 : i32 to vector<3x128xi32>
    %10 = arith.cmpi slt, %6, %9 : vector<3x128xi32>
    %11 = arith.andi %8, %10 : vector<3x128xi1>
    %cst_5 = arith.constant -1.000000e+30 : f32
    %12 = vector.broadcast %cst_5 : f32 to vector<3x128xf32>
    %13 = arith.select %11, %5, %12 : vector<3x128xi1>, vector<3x128xf32>
    %cst_6 = arith.constant dense<0xFF800000> : vector<3xf32>
    %14 = vector.multi_reduction <maximumf>, %13, %cst_6 [1] : vector<3x128xf32> to vector<3xf32>
    %15 = vector.shape_cast %14 : vector<3xf32> to vector<3x1xf32>
    %16 = vector.shape_cast %15 : vector<3x1xf32> to vector<3x1xf32>
    %17 = vector.broadcast %16 : vector<3x1xf32> to vector<3x128xf32>
    %18 = arith.select %11, %5, %17 : vector<3x128xi1>, vector<3x128xf32>
    %19 = vector.broadcast %15 : vector<3x1xf32> to vector<3x128xf32>
    %20 = arith.subf %18, %19 : vector<3x128xf32>
    %21 = math.exp %20 : vector<3x128xf32>
    %cst_7 = arith.constant 0.000000e+00 : f32
    %22 = vector.broadcast %cst_7 : f32 to vector<3x128xf32>
    %23 = arith.select %11, %21, %22 : vector<3x128xi1>, vector<3x128xf32>
    %cst_8 = arith.constant dense<0.000000e+00> : vector<3xf32>
    %24 = vector.multi_reduction <add>, %23, %cst_8 [1] : vector<3x128xf32> to vector<3xf32>
    %25 = vector.shape_cast %24 : vector<3xf32> to vector<3x1xf32>
    %26 = vector.broadcast %25 : vector<3x1xf32> to vector<3x128xf32>
    %27 = arith.divf %23, %26 : vector<3x128xf32>
    %28 = arith.select %11, %27, %5 : vector<3x128xi1>, vector<3x128xf32>
    %c0_9 = arith.constant 0 : index
    %c0_10 = arith.constant 0 : index
    %29 = vector.load %arg4[%c0_9, %c0_10] : memref<3x128xf32, #tpu.memory_space<vmem>>, vector<3x128xf32>
    tpu.vector_store %arg4[%c0_9, %c0_10], %28 {strides = array<i32>} : memref<3x128xf32, #tpu.memory_space<vmem>>, vector<3x128xf32>,
    return
  }
  func.func @transform_0(%arg0: i32) -> (i32, i32) {
    %c0_i32 = arith.constant 0 : i32
    %c0_i32_0 = arith.constant 0 : i32
    return %arg0, %c0_i32 : i32, i32
  }
  func.func @transform_1(%arg0: i32) -> (i32, i32) {
    %c0_i32 = arith.constant 0 : i32
    %c0_i32_0 = arith.constant 0 : i32
    %c0_i32_1 = arith.constant 0 : i32
    return %c0_i32, %c0_i32_0 : i32, i32
  }
  func.func @transform_2(%arg0: i32) -> (i32, i32) {
    %c0_i32 = arith.constant 0 : i32
    %c0_i32_0 = arith.constant 0 : i32
    %c0_i32_1 = arith.constant 0 : i32
    return %c0_i32, %c0_i32_0 : i32, i32
  }
  func.func @transform_3(%arg0: i32) -> (i32, i32) {
    %c0_i32 = arith.constant 0 : i32
    %c0_i32_0 = arith.constant 0 : i32
    return %arg0, %c0_i32 : i32, i32
  }
}

module attributes {stable_mosaic.version = 11 : i64} {
  func.func @_conv_block_kernel(%arg0: i32, %arg1: memref<1x6x256xbf16, #tpu.memory_space<vmem>>, %arg2: memref<1x6x256xbf16, #tpu.memory_space<vmem>>, %arg3: memref<4x256x128xbf16, #tpu.memory_space<vmem>>, %arg4: memref<1x128xf32, #tpu.memory_space<vmem>>, %arg5: memref<1x128xf32, #tpu.memory_space<vmem>>, %arg6: memref<1x4x128xbf16, #tpu.memory_space<vmem>>) attributes {dimension_semantics = [#tpu.dimension_semantics<parallel>], iteration_bounds = array<i64: 3>, scalar_prefetch = 0 : i64, scratch_operands = 0 : i64, tpu.core_type = #tpu.core_type<tc>, window_params = [{transform_indices = @transform_0, window_bounds = array<i64: 1, 6, 256>}, {transform_indices = @transform_1, window_bounds = array<i64: 1, 6, 256>}, {pipeline_mode = #tpu.pipeline_mode<synchronous>, transform_indices = @transform_2, window_bounds = array<i64: 4, 256, 128>}, {pipeline_mode = #tpu.pipeline_mode<synchronous>, transform_indices = @transform_3, window_bounds = array<i64: 1, 128>}, {pipeline_mode = #tpu.pipeline_mode<synchronous>, transform_indices = @transform_4, window_bounds = array<i64: 1, 128>}, {transform_indices = @transform_5, window_bounds = array<i64: 1, 4, 128>}]} {
    %c0 = arith.constant 0 : index
    %c0_0 = arith.constant 0 : index
    %c0_1 = arith.constant 0 : index
    %0 = vector.load %arg1[%c0, %c0_0, %c0_1] : memref<1x6x256xbf16, #tpu.memory_space<vmem>>, vector<1x4x256xbf16>
    %1 = vector.shape_cast %0 : vector<1x4x256xbf16> to vector<4x256xbf16>
    %c0_2 = arith.constant 0 : index
    %c0_3 = arith.constant 0 : index
    %c0_4 = arith.constant 0 : index
    %2 = vector.load %arg3[%c0_2, %c0_3, %c0_4] : memref<4x256x128xbf16, #tpu.memory_space<vmem>>, vector<1x256x128xbf16>
    %3 = vector.shape_cast %2 : vector<1x256x128xbf16> to vector<256x128xbf16>
    %cst = arith.constant dense<0.000000e+00> : vector<4x128xf32>
    %4 = tpu.matmul %1, %3, %cst {dimension_numbers = #tpu.dot_dimension_numbers<[1], [0], [0], [1], [0, 0, 1, 1], [], []>} : vector<4x256xbf16>, vector<256x128xbf16>, vector<4x128xf32> -> vector<4x128xf32>
    %c0_5 = arith.constant 0 : index
    %c0_6 = arith.constant 0 : index
    %c0_7 = arith.constant 0 : index
    %5 = vector.load %arg2[%c0_5, %c0_6, %c0_7] : memref<1x6x256xbf16, #tpu.memory_space<vmem>>, vector<1x4x256xbf16>
    %6 = vector.shape_cast %5 : vector<1x4x256xbf16> to vector<4x256xbf16>
    %c1 = arith.constant 1 : index
    %c0_8 = arith.constant 0 : index
    %c0_9 = arith.constant 0 : index
    %7 = vector.load %arg3[%c1, %c0_8, %c0_9] : memref<4x256x128xbf16, #tpu.memory_space<vmem>>, vector<1x256x128xbf16>
    %8 = vector.shape_cast %7 : vector<1x256x128xbf16> to vector<256x128xbf16>
    %cst_10 = arith.constant dense<0.000000e+00> : vector<4x128xf32>
    %9 = tpu.matmul %6, %8, %cst_10 {dimension_numbers = #tpu.dot_dimension_numbers<[1], [0], [0], [1], [0, 0, 1, 1], [], []>} : vector<4x256xbf16>, vector<256x128xbf16>, vector<4x128xf32> -> vector<4x128xf32>
    %10 = arith.addf %4, %9 : vector<4x128xf32>
    %c0_11 = arith.constant 0 : index
    %c2 = arith.constant 2 : index
    %c0_12 = arith.constant 0 : index
    %11 = vector.load %arg1[%c0_11, %c2, %c0_12] : memref<1x6x256xbf16, #tpu.memory_space<vmem>>, vector<1x4x256xbf16>
    %12 = vector.shape_cast %11 : vector<1x4x256xbf16> to vector<4x256xbf16>
    %c2_13 = arith.constant 2 : index
    %c0_14 = arith.constant 0 : index
    %c0_15 = arith.constant 0 : index
    %13 = vector.load %arg3[%c2_13, %c0_14, %c0_15] : memref<4x256x128xbf16, #tpu.memory_space<vmem>>, vector<1x256x128xbf16>
    %14 = vector.shape_cast %13 : vector<1x256x128xbf16> to vector<256x128xbf16>
    %cst_16 = arith.constant dense<0.000000e+00> : vector<4x128xf32>
    %15 = tpu.matmul %12, %14, %cst_16 {dimension_numbers = #tpu.dot_dimension_numbers<[1], [0], [0], [1], [0, 0, 1, 1], [], []>} : vector<4x256xbf16>, vector<256x128xbf16>, vector<4x128xf32> -> vector<4x128xf32>
    %16 = arith.addf %10, %15 : vector<4x128xf32>
    %c0_17 = arith.constant 0 : index
    %c2_18 = arith.constant 2 : index
    %c0_19 = arith.constant 0 : index
    %17 = vector.load %arg2[%c0_17, %c2_18, %c0_19] : memref<1x6x256xbf16, #tpu.memory_space<vmem>>, vector<1x4x256xbf16>
    %18 = vector.shape_cast %17 : vector<1x4x256xbf16> to vector<4x256xbf16>
    %c3 = arith.constant 3 : index
    %c0_20 = arith.constant 0 : index
    %c0_21 = arith.constant 0 : index
    %19 = vector.load %arg3[%c3, %c0_20, %c0_21] : memref<4x256x128xbf16, #tpu.memory_space<vmem>>, vector<1x256x128xbf16>
    %20 = vector.shape_cast %19 : vector<1x256x128xbf16> to vector<256x128xbf16>
    %cst_22 = arith.constant dense<0.000000e+00> : vector<4x128xf32>
    %21 = tpu.matmul %18, %20, %cst_22 {dimension_numbers = #tpu.dot_dimension_numbers<[1], [0], [0], [1], [0, 0, 1, 1], [], []>} : vector<4x256xbf16>, vector<256x128xbf16>, vector<4x128xf32> -> vector<4x128xf32>
    %22 = arith.addf %16, %21 : vector<4x128xf32>
    %c0_23 = arith.constant 0 : index
    %c0_24 = arith.constant 0 : index
    %23 = vector.load %arg4[%c0_23, %c0_24] : memref<1x128xf32, #tpu.memory_space<vmem>>, vector<1x128xf32>
    %24 = vector.broadcast %23 : vector<1x128xf32> to vector<4x128xf32>
    %25 = arith.addf %22, %24 : vector<4x128xf32>
    %cst_25 = arith.constant 0.000000e+00 : f32
    %26 = vector.broadcast %cst_25 : f32 to vector<4x128xf32>
    %27 = arith.cmpf ogt, %25, %26 : vector<4x128xf32>
    %cst_26 = arith.constant 2.000000e-01 : f32
    %28 = vector.broadcast %cst_26 : f32 to vector<4x128xf32>
    %29 = arith.mulf %28, %25 : vector<4x128xf32>
    %30 = arith.select %27, %25, %29 : vector<4x128xi1>, vector<4x128xf32>
    %c0_27 = arith.constant 0 : index
    %c0_28 = arith.constant 0 : index
    %31 = vector.load %arg5[%c0_27, %c0_28] : memref<1x128xf32, #tpu.memory_space<vmem>>, vector<1x128xf32>
    %32 = vector.broadcast %31 : vector<1x128xf32> to vector<4x128xf32>
    %33 = arith.addf %30, %32 : vector<4x128xf32>
    %34 = arith.truncf %33 : vector<4x128xf32> to vector<4x128xbf16>
    %c0_29 = arith.constant 0 : index
    %c0_30 = arith.constant 0 : index
    %c0_31 = arith.constant 0 : index
    %35 = vector.load %arg6[%c0_29, %c0_30, %c0_31] : memref<1x4x128xbf16, #tpu.memory_space<vmem>>, vector<1x4x128xbf16>
    %36 = vector.shape_cast %35 : vector<1x4x128xbf16> to vector<4x128xbf16>
    %37 = vector.shape_cast %34 : vector<4x128xbf16> to vector<1x4x128xbf16>
    tpu.vector_store %arg6[%c0_29, %c0_30, %c0_31], %37 {strides = array<i32>} : memref<1x4x128xbf16, #tpu.memory_space<vmem>>, vector<1x4x128xbf16>,
    return
  }
  func.func @transform_0(%arg0: i32) -> (i32, i32, i32) {
    %c0_i32 = arith.constant 0 : i32
    %c0_i32_0 = arith.constant 0 : i32
    %c0_i32_1 = arith.constant 0 : i32
    return %arg0, %c0_i32, %c0_i32_0 : i32, i32, i32
  }
  func.func @transform_1(%arg0: i32) -> (i32, i32, i32) {
    %c0_i32 = arith.constant 0 : i32
    %c0_i32_0 = arith.constant 0 : i32
    %c0_i32_1 = arith.constant 0 : i32
    return %arg0, %c0_i32, %c0_i32_0 : i32, i32, i32
  }
  func.func @transform_2(%arg0: i32) -> (i32, i32, i32) {
    %c0_i32 = arith.constant 0 : i32
    %c0_i32_0 = arith.constant 0 : i32
    %c0_i32_1 = arith.constant 0 : i32
    %c0_i32_2 = arith.constant 0 : i32
    return %c0_i32, %c0_i32_0, %c0_i32_1 : i32, i32, i32
  }
  func.func @transform_3(%arg0: i32) -> (i32, i32) {
    %c0_i32 = arith.constant 0 : i32
    %c0_i32_0 = arith.constant 0 : i32
    %c0_i32_1 = arith.constant 0 : i32
    return %c0_i32, %c0_i32_0 : i32, i32
  }
  func.func @transform_4(%arg0: i32) -> (i32, i32) {
    %c0_i32 = arith.constant 0 : i32
    %c0_i32_0 = arith.constant 0 : i32
    %c0_i32_1 = arith.constant 0 : i32
    return %c0_i32, %c0_i32_0 : i32, i32
  }
  func.func @transform_5(%arg0: i32) -> (i32, i32, i32) {
    %c0_i32 = arith.constant 0 : i32
    %c0_i32_0 = arith.constant 0 : i32
    %c0_i32_1 = arith.constant 0 : i32
    return %arg0, %c0_i32, %c0_i32_0 : i32, i32, i32
  }
}

</mosaic_0001>

<bundles_post_ra>
// kernel: discriminator_forward.5
= control target key start
LH: loop header
LB: loop body
LE: loop exit
PB: predicated region body
PF: predicated region fallthrough
CT: control target
= control target key end

     0   :  { %s2122_s18 = smov 0   ;;  %s2446_s0 = inlined_call_operand.vmem [shape: bf16[3,272,12], index: 0, kind: input, shape index: {}]   ;;  %s2447_s1 = inlined_call_operand.vmem [shape: bf16[3,272,12], index: 1, kind: input, shape index: {}]   ;;  %s2448_s2 = inlined_call_operand.vmem [shape: bf16[4,12,16], index: 2, kind: input, shape index: {}]   ;;  %s2449_s3 = inlined_call_operand.vmem [shape: f32[1,16], index: 3, kind: input, shape index: {}]   ;;  %s2450_s4 = inlined_call_operand.vmem [shape: f32[1,16], index: 4, kind: input, shape index: {}]   ;;  %s2451_s5 = inlined_call_operand.vmem [shape: bf16[3,256,16], index: 5, kind: output, shape index: {}]  }
   0x1 LB: > { %s1651_s19 = sadd.s32 4294967295, %s2090_s18   ;;  %p1655_p0 = scmp.ge.s32.totalorder %s2090_s18, 1  ;;  %s2090_s18 = sphi %s2122_s18, %s15_s18  }
   0x2   : > { %p197_p1 = scmp.lt.s32.totalorder %s2090_s18, 4 }
   0x4   : > { %p198_p2 = pnand %p1655_p0, %p197_p1 }
   0x5   : > { %p230_p3 = scmp.lt.s32.totalorder (!%p198_p2), %s1651_s19, 2 }
   0x6   : > { %201 = sbr.rel (%p198_p2) target bundleno = 414 (0x19e), region = 40 }
   0xb   : > { %v1728_v0 = vld [vmem:[%s2448_s2 + $0x8] sm:$0xf]  ;;  %v2038_v1 = vld [vmem:[%s2448_s2 + $0x8] sm:$0x30]  ;;  %vm449_vm0 = vcmask 1045504   ;;  %s2453_s19 = smov (!%p230_p3, %s1651_s19), 2 }
   0xc   : > { %v1729_v2 = vor.u32 %v2038_v1, %v1728_v0  ;;  %v1812_v3 = vld [vmem:[%s2448_s2] sm:$0xf]  ;;  %v2021_v4 = vld [vmem:[%s2448_s2] sm:$0x30]  ;;  %v1898_v5 = vld [vmem:[%s2448_s2 + $0x10] sm:$0xf] }
   0xd   : > { %v1813_v6 = vor.u32 %v2021_v4, %v1812_v3  ;;  %v2055_v7 = vld [vmem:[%s2448_s2 + $0x10] sm:$0x30]  ;;  %v1984_v8 = vld [vmem:[%s2448_s2 + $0x18] sm:$0xf]  ;;  %v2072_v9 = vld [vmem:[%s2448_s2 + $0x18] sm:$0x30] }
   0xe   : > { %v451_v10 = vsel %vm449_vm0, %v1729_v2, 0  ;;  %v1899_v11 = vor.u32 %v2055_v7, %v1898_v5  ;;  %v1985_v12 = vor.u32 %v2072_v9, %v1984_v8  ;;  %s2073_s11 = smul.u32 136, %s2453_s19  ;;  %vm400_vm1 = vcmask 97280   ;;  %v2246_v58 = vld [vmem:[%s2449_s3] ss:$0 sm:$0xff]  ;;  %s2004_s24 = sshll.u32 %s2453_s19, 7 }
   0xf   : > { %460 = vmatpush.bf16.msra.mxu0 %v451_v10  ;;  %v676_v13 = vsel %vm449_vm0, %v1813_v6, 0  ;;  %v2252_v63 = vld [vmem:[%s2450_s4] ss:$0 sm:$0xff]  ;;  %s2263_s27 = scalar_lea.vmem %s2451_s5, %s2004_s24  ;;  %vm1551_vm3 = vcmask 125952  }
  0x10   : > { %685 = vmatpush.bf16.msra.mxu1 %v676_v13  ;;  %v936_v14 = vsel %vm449_vm0, %v1899_v11, 0  ;;  %v1228_v15 = vsel %vm449_vm0, %v1985_v12, 0  ;;  %s2164_s14 = scalar_lea.vmem %s2447_s1, %s2073_s11  ;;  %s2169_s17 = scalar_lea.vmem %s2446_s0, %s2073_s11 }
  0x11   : > { %945 = vmatpush.bf16.msra.mxu2 %v936_v14  ;;  %1237 = vmatpush.bf16.msra.mxu3 %v1228_v15  ;;  %v2022_v16 = vld [vmem:[%s2164_s14] sm:$0xff]  ;;  %v2039_v18 = vld [vmem:[%s2169_s17 + $0x8] sm:$0xff]  ;;  %v2040_v22 = vld [vmem:[%s2169_s17 + $0x10] sm:$0xff] }
  0x12   : > { %v2005_v17 = vld [vmem:[%s2169_s17] sm:$0xff]  ;;  %v2056_v19 = vld [vmem:[%s2164_s14 + $0x8] sm:$0xff]  ;;  %1730 = vmatmul.msk.bf16.vlgmr.msra.gmra.mxu0 %vm400_vm1, %v2022_v16  ;;  %v2057_v23 = vld [vmem:[%s2164_s14 + $0x10] sm:$0xff] }
  0x13   : > { %1814 = vmatmul.msk.bf16.vlgmr.msra.gmra.mxu1 %vm400_vm1, %v2005_v17  ;;  %v2023_v20 = vld [vmem:[%s2164_s14 + $0x8] sm:$0xff]  ;;  %v2024_v24 = vld [vmem:[%s2164_s14 + $0x10] sm:$0xff]  ;;  %v2041_v26 = vld [vmem:[%s2169_s17 + $0x18] sm:$0xff] }
  0x14   : > { %1900 = vmatmul.msk.bf16.vlgmr.msra.gmra.mxu2 %vm400_vm1, %v2039_v18  ;;  %1986 = vmatmul.msk.bf16.vlgmr.msra.gmra.mxu3 %vm400_vm1, %v2056_v19  ;;  %v2006_v21 = vld [vmem:[%s2169_s17 + $0x8] sm:$0xff]  ;;  %v2007_v25 = vld [vmem:[%s2169_s17 + $0x10] sm:$0xff]  ;;  %v2058_v27 = vld [vmem:[%s2164_s14 + $0x18] sm:$0xff] }
  0x15   : > { %v2025_v28 = vld [vmem:[%s2164_s14 + $0x18] sm:$0xff]  ;;  %v2042_v30 = vld [vmem:[%s2169_s17 + $0x20] sm:$0xff]  ;;  %v2043_v34 = vld [vmem:[%s2169_s17 + $0x28] sm:$0xff] }
  0x16   : > { %v2008_v29 = vld [vmem:[%s2169_s17 + $0x18] sm:$0xff]  ;;  %v2059_v31 = vld [vmem:[%s2164_s14 + $0x20] sm:$0xff]  ;;  %v2060_v35 = vld [vmem:[%s2164_s14 + $0x28] sm:$0xff] }
  0x17   : > { %v2026_v32 = vld [vmem:[%s2164_s14 + $0x20] sm:$0xff]  ;;  %v2027_v36 = vld [vmem:[%s2164_s14 + $0x28] sm:$0xff]  ;;  %v2044_v38 = vld [vmem:[%s2169_s17 + $0x30] sm:$0xff] }
  0x18   : > { %v2009_v33 = vld [vmem:[%s2169_s17 + $0x20] sm:$0xff]  ;;  %v2010_v37 = vld [vmem:[%s2169_s17 + $0x28] sm:$0xff]  ;;  %v2061_v39 = vld [vmem:[%s2164_s14 + $0x30] sm:$0xff] }
  0x19   : > { %v2028_v40 = vld [vmem:[%s2164_s14 + $0x30] sm:$0xff]  ;;  %v2045_v42 = vld [vmem:[%s2169_s17 + $0x38] sm:$0xff]  ;;  %v2046_v46 = vld [vmem:[%s2169_s17 + $0x40] sm:$0xff] }
  0x1a   : > { %v2011_v41 = vld [vmem:[%s2169_s17 + $0x30] sm:$0xff]  ;;  %v2062_v43 = vld [vmem:[%s2164_s14 + $0x38] sm:$0xff]  ;;  %v2063_v47 = vld [vmem:[%s2164_s14 + $0x40] sm:$0xff] }
  0x1b   : > { %v2029_v44 = vld [vmem:[%s2164_s14 + $0x38] sm:$0xff]  ;;  %v2030_v48 = vld [vmem:[%s2164_s14 + $0x40] sm:$0xff]  ;;  %v2047_v52 = vld [vmem:[%s2169_s17 + $0x48] sm:$0xff] }
  0x1c   : > { %v2012_v45 = vld [vmem:[%s2169_s17 + $0x38] sm:$0xff]  ;;  %v2013_v49 = vld [vmem:[%s2169_s17 + $0x40] sm:$0xff]  ;;  %v2064_v53 = vld [vmem:[%s2164_s14 + $0x48] sm:$0xff] }
  0x1d   : > { %v2031_v4 = vld [vmem:[%s2164_s14 + $0x48] sm:$0xff]  ;;  %v2048_v10 = vld [vmem:[%s2169_s17 + $0x50] sm:$0xff] }
  0x1e   : > { %v2014_v5 = vld [vmem:[%s2169_s17 + $0x48] sm:$0xff]  ;;  %v2065_v11 = vld [vmem:[%s2164_s14 + $0x50] sm:$0xff] }
  0x22   : > { %1731 = vmatmul.msk.bf16.gmra.mxu0 %vm400_vm1, %v2023_v20 }
  0x23   : > { %1815 = vmatmul.msk.bf16.gmra.mxu1 %vm400_vm1, %v2006_v21 }
  0x24   : > { %1901 = vmatmul.msk.bf16.gmra.mxu2 %vm400_vm1, %v2040_v22  ;;  %1987 = vmatmul.msk.bf16.gmra.mxu3 %vm400_vm1, %v2057_v23 }
  0x32   : > { %1732 = vmatmul.msk.bf16.gmra.mxu0 %vm400_vm1, %v2024_v24 }
  0x33   : > { %1816 = vmatmul.msk.bf16.gmra.mxu1 %vm400_vm1, %v2007_v25 }
  0x34   : > { %1902 = vmatmul.msk.bf16.gmra.mxu2 %vm400_vm1, %v2041_v26  ;;  %1988 = vmatmul.msk.bf16.gmra.mxu3 %vm400_vm1, %v2058_v27 }
  0x42   : > { %1733 = vmatmul.msk.bf16.gmra.mxu0 %vm400_vm1, %v2025_v28 }
  0x43   : > { %1817 = vmatmul.msk.bf16.gmra.mxu1 %vm400_vm1, %v2008_v29 }
  0x44   : > { %1903 = vmatmul.msk.bf16.gmra.mxu2 %vm400_vm1, %v2042_v30  ;;  %1989 = vmatmul.msk.bf16.gmra.mxu3 %vm400_vm1, %v2059_v31 }
  0x52   : > { %1734 = vmatmul.msk.bf16.gmra.mxu0 %vm400_vm1, %v2026_v32  ;;  %v2032_v32 = vld [vmem:[%s2164_s14 + $0x50] sm:$0xff] }
  0x53   : > { %1818 = vmatmul.msk.bf16.gmra.mxu1 %vm400_vm1, %v2009_v33  ;;  %v2015_v33 = vld [vmem:[%s2169_s17 + $0x50] sm:$0xff] }
  0x54   : > { %1904 = vmatmul.msk.bf16.gmra.mxu2 %vm400_vm1, %v2043_v34  ;;  %1990 = vmatmul.msk.bf16.gmra.mxu3 %vm400_vm1, %v2060_v35 }
  0x62   : > { %1735 = vmatmul.msk.bf16.gmra.mxu0 %vm400_vm1, %v2027_v36 }
  0x63   : > { %1819 = vmatmul.msk.bf16.gmra.mxu1 %vm400_vm1, %v2010_v37 }
  0x64   : > { %1905 = vmatmul.msk.bf16.gmra.mxu2 %vm400_vm1, %v2044_v38  ;;  %1991 = vmatmul.msk.bf16.gmra.mxu3 %vm400_vm1, %v2061_v39  ;;  %v2049_v38 = vld [vmem:[%s2169_s17 + $0x58] sm:$0xff] }
  0x65   : > { %v2066_v39 = vld [vmem:[%s2164_s14 + $0x58] sm:$0xff] }
  0x72   : > { %1736 = vmatmul.msk.bf16.gmra.mxu0 %vm400_vm1, %v2028_v40 }
  0x73   : > { %1820 = vmatmul.msk.bf16.gmra.mxu1 %vm400_vm1, %v2011_v41 }
  0x74   : > { %1906 = vmatmul.msk.bf16.gmra.mxu2 %vm400_vm1, %v2045_v42  ;;  %1992 = vmatmul.msk.bf16.gmra.mxu3 %vm400_vm1, %v2062_v43 }
  0x82   : > { %1737 = vmatmul.msk.bf16.gmra.mxu0 %vm400_vm1, %v2029_v44 }
  0x83   : > { %1821 = vmatmul.msk.bf16.gmra.mxu1 %vm400_vm1, %v2012_v45 }
  0x84   : > { %1907 = vmatmul.msk.bf16.gmra.mxu2 %vm400_vm1, %v2046_v46  ;;  %1993 = vmatmul.msk.bf16.gmra.mxu3 %vm400_vm1, %v2063_v47 }
  0x8f   : > { %v462_v50 = vpop.f32.mrf.mxu0 }
  0x90   : > { %v687_v51 = vpop.f32.mrf.mxu1 }
  0x91   : > { %v688_v54 = vadd.f32 %v687_v51, %v462_v50 }
  0x92   : > { %1738 = vmatmul.msk.bf16.gmra.mxu0 %vm400_vm1, %v2030_v48 }
  0x93   : > { %1822 = vmatmul.msk.bf16.gmra.mxu1 %vm400_vm1, %v2013_v49 }
  0x94   : > { %1908 = vmatmul.msk.bf16.gmra.mxu2 %vm400_vm1, %v2047_v52  ;;  %1994 = vmatmul.msk.bf16.gmra.mxu3 %vm400_vm1, %v2064_v53 }
  0x97   : > { %v947_v55 = vpop.f32.mrf.mxu2  ;;  %v1239_v56 = vpop.f32.mrf.mxu3 }
  0x98   : > { %v1027_v57 = vadd.f32 %v947_v55, %v688_v54  ;;  %v464_v59 = vpop.f32.mrf.mxu0  ;;  %v689_v60 = vpop.f32.mrf.mxu1 }
  0x99   : > { %v690_v1 = vadd.f32 %v689_v60, %v464_v59 }
  0x9a   : > { %v1319_v61 = vadd.f32 %v1239_v56, %v1027_v57 }
  0x9c   : > { %v1355_v62 = vadd.f32 %v2246_v58, %v1319_v61  ;;  %v2033_v61 = vld [vmem:[%s2164_s14 + $0x58] sm:$0xff] }
  0x9e   : > { %vm1387_vm2 = vcmp.gt.f32.partialorder %v1355_v62, 0.0  ;;  %v1419_v0 = vmul.f32 0.2, %v1355_v62 }
  0x9f   : > { %v949_v2 = vpop.f32.mrf.mxu2  ;;  %v1241_v3 = vpop.f32.mrf.mxu3 }
  0xa0   : > { %v1451_v6 = vsel %vm1387_vm2, %v1355_v62, %v1419_v0  ;;  %v1028_v7 = vadd.f32 %v949_v2, %v690_v1  ;;  %v467_v8 = vpop.f32.mrf.mxu0  ;;  %v692_v9 = vpop.f32.mrf.mxu1  ;;  %v2016_v62 = vld [vmem:[%s2169_s17 + $0x58] sm:$0xff] }
  0xa1   : > { %v1487_v12 = vadd.f32 %v2252_v63, %v1451_v6  ;;  %v693_v16 = vadd.f32 %v692_v9, %v467_v8 }
  0xa2   : > { %v1320_v13 = vadd.f32 %v1241_v3, %v1028_v7  ;;  %1739 = vmatmul.msk.bf16.gmra.mxu0 %vm400_vm1, %v2031_v4  ;;  %v2050_v4 = vld [vmem:[%s2169_s17 + $0x60] sm:$0xff] }
  0xa3   : > { %v1519_v14 = vpack.c.bf16 %v1487_v12, %v1487_v12  ;;  %1823 = vmatmul.msk.bf16.gmra.mxu1 %vm400_vm1, %v2014_v5  ;;  %v2067_v5 = vld [vmem:[%s2164_s14 + $0x60] sm:$0xff] }
  0xa4   : > { %v1356_v15 = vadd.f32 %v2246_v58, %v1320_v13  ;;  %1909 = vmatmul.msk.bf16.gmra.mxu2 %vm400_vm1, %v2048_v10  ;;  %1995 = vmatmul.msk.bf16.gmra.mxu3 %vm400_vm1, %v2065_v11 }
  0xa5   : > { %1552 = vst.msk [vmem:[%s2263_s27] sm:$0xf] %vm1551_vm3, %v1519_v14 }
  0xa6   : > { %vm1388_vm4 = vcmp.gt.f32.partialorder %v1356_v15, 0.0  ;;  %v1420_v17 = vmul.f32 0.2, %v1356_v15 }
  0xa7   : > { %v952_v18 = vpop.f32.mrf.mxu2  ;;  %v1244_v19 = vpop.f32.mrf.mxu3 }
  0xa8   : > { %v1452_v20 = vsel %vm1388_vm4, %v1356_v15, %v1420_v17  ;;  %v1029_v21 = vadd.f32 %v952_v18, %v693_v16  ;;  %v469_v22 = vpop.f32.mrf.mxu0  ;;  %v694_v23 = vpop.f32.mrf.mxu1 }
  0xa9   : > { %v1488_v24 = vadd.f32 %v2252_v63, %v1452_v20  ;;  %v695_v29 = vadd.f32 %v694_v23, %v469_v22 }
  0xaa   : > { %v1321_v25 = vadd.f32 %v1244_v19, %v1029_v21 }
  0xab   : > { %v1520_v26 = vpack.c.bf16 %v1488_v24, %v1488_v24 }
  0xac   : > { %v1357_v27 = vadd.f32 %v2246_v58, %v1321_v25 }
  0xad   : > { %1553 = vst.msk [vmem:[%s2263_s27 + $0x4] sm:$0xf] %vm1551_vm3, %v1520_v26  ;;  %v2034_v26 = vld [vmem:[%s2164_s14 + $0x60] sm:$0xff] }
  0xae   : > { %vm1389_vm5 = vcmp.gt.f32.partialorder %v1357_v27, 0.0  ;;  %v1421_v28 = vmul.f32 0.2, %v1357_v27 }
  0xaf   : > { %v954_v30 = vpop.f32.mrf.mxu2  ;;  %v1246_v31 = vpop.f32.mrf.mxu3 }
  0xb0   : > { %v1453_v34 = vsel %vm1389_vm5, %v1357_v27, %v1421_v28  ;;  %v1030_v35 = vadd.f32 %v954_v30, %v695_v29  ;;  %v472_v36 = vpop.f32.mrf.mxu0  ;;  %v697_v37 = vpop.f32.mrf.mxu1  ;;  %v2017_v27 = vld [vmem:[%s2169_s17 + $0x60] sm:$0xff] }
  0xb1   : > { %v1489_v40 = vadd.f32 %v2252_v63, %v1453_v34  ;;  %v698_v44 = vadd.f32 %v697_v37, %v472_v36 }
  0xb2   : > { %v1322_v41 = vadd.f32 %v1246_v31, %v1030_v35  ;;  %1740 = vmatmul.msk.bf16.gmra.mxu0 %vm400_vm1, %v2032_v32  ;;  %v2051_v32 = vld [vmem:[%s2169_s17 + $0x68] sm:$0xff] }
  0xb3   : > { %v1521_v42 = vpack.c.bf16 %v1489_v40, %v1489_v40  ;;  %1824 = vmatmul.msk.bf16.gmra.mxu1 %vm400_vm1, %v2015_v33  ;;  %v2068_v33 = vld [vmem:[%s2164_s14 + $0x68] sm:$0xff] }
  0xb4   : > { %v1358_v43 = vadd.f32 %v2246_v58, %v1322_v41  ;;  %1910 = vmatmul.msk.bf16.gmra.mxu2 %vm400_vm1, %v2049_v38  ;;  %1996 = vmatmul.msk.bf16.gmra.mxu3 %vm400_vm1, %v2066_v39 }
  0xb5   : > { %1554 = vst.msk [vmem:[%s2263_s27 + $0x8] sm:$0xf] %vm1551_vm3, %v1521_v42 }
  0xb6   : > { %vm1390_vm6 = vcmp.gt.f32.partialorder %v1358_v43, 0.0  ;;  %v1422_v45 = vmul.f32 0.2, %v1358_v43 }
  0xb7   : > { %v957_v46 = vpop.f32.mrf.mxu2  ;;  %v1249_v47 = vpop.f32.mrf.mxu3 }
  0xb8   : > { %v1454_v48 = vsel %vm1390_vm6, %v1358_v43, %v1422_v45  ;;  %v1031_v49 = vadd.f32 %v957_v46, %v698_v44  ;;  %v474_v50 = vpop.f32.mrf.mxu0  ;;  %v699_v51 = vpop.f32.mrf.mxu1 }
  0xb9   : > { %v1490_v52 = vadd.f32 %v2252_v63, %v1454_v48  ;;  %v700_v57 = vadd.f32 %v699_v51, %v474_v50 }
  0xba   : > { %v1323_v53 = vadd.f32 %v1249_v47, %v1031_v49 }
  0xbb   : > { %v1522_v54 = vpack.c.bf16 %v1490_v52, %v1490_v52 }
  0xbc   : > { %v1359_v55 = vadd.f32 %v2246_v58, %v1323_v53 }
  0xbd   : > { %1555 = vst.msk [vmem:[%s2263_s27 + $0xc] sm:$0xf] %vm1551_vm3, %v1522_v54  ;;  %v2035_v54 = vld [vmem:[%s2164_s14 + $0x68] sm:$0xff] }
  0xbe   : > { %vm1391_vm7 = vcmp.gt.f32.partialorder %v1359_v55, 0.0  ;;  %v1423_v56 = vmul.f32 0.2, %v1359_v55 }
  0xbf   : > { %v959_v59 = vpop.f32.mrf.mxu2  ;;  %v1251_v60 = vpop.f32.mrf.mxu3 }
  0xc0   : > { %v1455_v0 = vsel %vm1391_vm7, %v1359_v55, %v1423_v56  ;;  %v1032_v1 = vadd.f32 %v959_v59, %v700_v57  ;;  %v477_v2 = vpop.f32.mrf.mxu0  ;;  %v702_v3 = vpop.f32.mrf.mxu1  ;;  %v2018_v55 = vld [vmem:[%s2169_s17 + $0x68] sm:$0xff] }
  0xc1   : > { %v1491_v6 = vadd.f32 %v2252_v63, %v1455_v0  ;;  %v703_v10 = vadd.f32 %v702_v3, %v477_v2 }
  0xc2   : > { %v1324_v7 = vadd.f32 %v1251_v60, %v1032_v1  ;;  %1741 = vmatmul.msk.bf16.gmra.mxu0 %vm400_vm1, %v2033_v61  ;;  %v2052_v61 = vld [vmem:[%s2169_s17 + $0x70] sm:$0xff] }
  0xc3   : > { %v1523_v8 = vpack.c.bf16 %v1491_v6, %v1491_v6  ;;  %1825 = vmatmul.msk.bf16.gmra.mxu1 %vm400_vm1, %v2016_v62  ;;  %v2069_v62 = vld [vmem:[%s2164_s14 + $0x70] sm:$0xff] }
  0xc4   : > { %v1360_v9 = vadd.f32 %v2246_v58, %v1324_v7  ;;  %1911 = vmatmul.msk.bf16.gmra.mxu2 %vm400_vm1, %v2050_v4  ;;  %1997 = vmatmul.msk.bf16.gmra.mxu3 %vm400_vm1, %v2067_v5 }
  0xc5   : > { %1556 = vst.msk [vmem:[%s2263_s27 + $0x10] sm:$0xf] %vm1551_vm3, %v1523_v8 }
  0xc6   : > { %vm1392_vm8 = vcmp.gt.f32.partialorder %v1360_v9, 0.0  ;;  %v1424_v11 = vmul.f32 0.2, %v1360_v9 }
  0xc7   : > { %v962_v12 = vpop.f32.mrf.mxu2  ;;  %v1254_v13 = vpop.f32.mrf.mxu3 }
  0xc8   : > { %v1456_v14 = vsel %vm1392_vm8, %v1360_v9, %v1424_v11  ;;  %v1033_v15 = vadd.f32 %v962_v12, %v703_v10  ;;  %v479_v16 = vpop.f32.mrf.mxu0  ;;  %v704_v17 = vpop.f32.mrf.mxu1 }
  0xc9   : > { %v1492_v18 = vadd.f32 %v2252_v63, %v1456_v14  ;;  %v705_v23 = vadd.f32 %v704_v17, %v479_v16 }
  0xca   : > { %v1325_v19 = vadd.f32 %v1254_v13, %v1033_v15 }
  0xcb   : > { %v1524_v20 = vpack.c.bf16 %v1492_v18, %v1492_v18 }
  0xcc   : > { %v1361_v21 = vadd.f32 %v2246_v58, %v1325_v19 }
  0xcd   : > { %1557 = vst.msk [vmem:[%s2263_s27 + $0x14] sm:$0xf] %vm1551_vm3, %v1524_v20  ;;  %v2036_v20 = vld [vmem:[%s2164_s14 + $0x70] sm:$0xff] }
  0xce   : > { %vm1393_vm9 = vcmp.gt.f32.partialorder %v1361_v21, 0.0  ;;  %v1425_v22 = vmul.f32 0.2, %v1361_v21 }
  0xcf   : > { %v964_v24 = vpop.f32.mrf.mxu2  ;;  %v1256_v25 = vpop.f32.mrf.mxu3 }
  0xd0   : > { %v1457_v28 = vsel %vm1393_vm9, %v1361_v21, %v1425_v22  ;;  %v1034_v29 = vadd.f32 %v964_v24, %v705_v23  ;;  %v482_v30 = vpop.f32.mrf.mxu0  ;;  %v707_v31 = vpop.f32.mrf.mxu1  ;;  %v2019_v21 = vld [vmem:[%s2169_s17 + $0x70] sm:$0xff] }
  0xd1   : > { %v1493_v34 = vadd.f32 %v2252_v63, %v1457_v28  ;;  %v708_v38 = vadd.f32 %v707_v31, %v482_v30 }
  0xd2   : > { %v1326_v35 = vadd.f32 %v1256_v25, %v1034_v29  ;;  %1742 = vmatmul.msk.bf16.gmra.mxu0 %vm400_vm1, %v2034_v26  ;;  %v2053_v26 = vld [vmem:[%s2169_s17 + $0x78] sm:$0xff] }
  0xd3   : > { %v1525_v36 = vpack.c.bf16 %v1493_v34, %v1493_v34  ;;  %1826 = vmatmul.msk.bf16.gmra.mxu1 %vm400_vm1, %v2017_v27  ;;  %v2070_v27 = vld [vmem:[%s2164_s14 + $0x78] sm:$0xff] }
  0xd4   : > { %v1362_v37 = vadd.f32 %v2246_v58, %v1326_v35  ;;  %1912 = vmatmul.msk.bf16.gmra.mxu2 %vm400_vm1, %v2051_v32  ;;  %1998 = vmatmul.msk.bf16.gmra.mxu3 %vm400_vm1, %v2068_v33 }
  0xd5   : > { %1558 = vst.msk [vmem:[%s2263_s27 + $0x18] sm:$0xf] %vm1551_vm3, %v1525_v36 }
  0xd6   : > { %vm1394_vm10 = vcmp.gt.f32.partialorder %v1362_v37, 0.0  ;;  %v1426_v39 = vmul.f32 0.2, %v1362_v37 }
  0xd7   : > { %v967_v40 = vpop.f32.mrf.mxu2  ;;  %v1259_v41 = vpop.f32.mrf.mxu3 }
  0xd8   : > { %v1458_v42 = vsel %vm1394_vm10, %v1362_v37, %v1426_v39  ;;  %v1035_v43 = vadd.f32 %v967_v40, %v708_v38  ;;  %v484_v44 = vpop.f32.mrf.mxu0  ;;  %v709_v45 = vpop.f32.mrf.mxu1 }
  0xd9   : > { %v1494_v46 = vadd.f32 %v2252_v63, %v1458_v42  ;;  %v710_v51 = vadd.f32 %v709_v45, %v484_v44 }
  0xda   : > { %v1327_v47 = vadd.f32 %v1259_v41, %v1035_v43 }
  0xdb   : > { %v1526_v48 = vpack.c.bf16 %v1494_v46, %v1494_v46 }
  0xdc   : > { %v1363_v49 = vadd.f32 %v2246_v58, %v1327_v47 }
  0xdd   : > { %1559 = vst.msk [vmem:[%s2263_s27 + $0x1c] sm:$0xf] %vm1551_vm3, %v1526_v48  ;;  %v2037_v48 = vld [vmem:[%s2164_s14 + $0x78] sm:$0xff] }
  0xde   : > { %vm1395_vm11 = vcmp.gt.f32.partialorder %v1363_v49, 0.0  ;;  %v1427_v50 = vmul.f32 0.2, %v1363_v49 }
  0xdf   : > { %v969_v52 = vpop.f32.mrf.mxu2  ;;  %v1261_v53 = vpop.f32.mrf.mxu3 }
  0xe0   : > { %v1459_v56 = vsel %vm1395_vm11, %v1363_v49, %v1427_v50  ;;  %v1036_v57 = vadd.f32 %v969_v52, %v710_v51  ;;  %v487_v59 = vpop.f32.mrf.mxu0  ;;  %v712_v60 = vpop.f32.mrf.mxu1  ;;  %v2020_v49 = vld [vmem:[%s2169_s17 + $0x78] sm:$0xff] }
  0xe1   : > { %v1495_v0 = vadd.f32 %v2252_v63, %v1459_v56  ;;  %v713_v4 = vadd.f32 %v712_v60, %v487_v59 }
  0xe2   : > { %v1328_v1 = vadd.f32 %v1261_v53, %v1036_v57  ;;  %1743 = vmatmul.msk.bf16.gmra.mxu0 %vm400_vm1, %v2035_v54  ;;  %v2054_v54 = vld [vmem:[%s2169_s17 + $0x80] sm:$0xff] }
  0xe3   : > { %v1527_v2 = vpack.c.bf16 %v1495_v0, %v1495_v0  ;;  %1827 = vmatmul.msk.bf16.gmra.mxu1 %vm400_vm1, %v2018_v55  ;;  %v2071_v55 = vld [vmem:[%s2164_s14 + $0x80] sm:$0xff] }
  0xe4   : > { %v1364_v3 = vadd.f32 %v2246_v58, %v1328_v1  ;;  %1913 = vmatmul.msk.bf16.gmra.mxu2 %vm400_vm1, %v2052_v61  ;;  %1999 = vmatmul.msk.bf16.gmra.mxu3 %vm400_vm1, %v2069_v62 }
  0xe5   : > { %1560 = vst.msk [vmem:[%s2263_s27 + $0x20] sm:$0xf] %vm1551_vm3, %v1527_v2 }
  0xe6   : > { %vm1396_vm12 = vcmp.gt.f32.partialorder %v1364_v3, 0.0  ;;  %v1428_v5 = vmul.f32 0.2, %v1364_v3 }
  0xe7   : > { %v972_v6 = vpop.f32.mrf.mxu2  ;;  %v1264_v7 = vpop.f32.mrf.mxu3 }
  0xe8   : > { %v1460_v8 = vsel %vm1396_vm12, %v1364_v3, %v1428_v5  ;;  %v1037_v9 = vadd.f32 %v972_v6, %v713_v4  ;;  %v489_v10 = vpop.f32.mrf.mxu0  ;;  %v714_v11 = vpop.f32.mrf.mxu1 }
  0xe9   : > { %v1496_v12 = vadd.f32 %v2252_v63, %v1460_v8  ;;  %v715_v17 = vadd.f32 %v714_v11, %v489_v10 }
  0xea   : > { %v1329_v13 = vadd.f32 %v1264_v7, %v1037_v9 }
  0xeb   : > { %v1528_v14 = vpack.c.bf16 %v1496_v12, %v1496_v12 }
  0xec   : > { %v1365_v15 = vadd.f32 %v2246_v58, %v1329_v13 }
  0xed   : > { %1561 = vst.msk [vmem:[%s2263_s27 + $0x24] sm:$0xf] %vm1551_vm3, %v1528_v14 }
  0xee   : > { %vm1397_vm13 = vcmp.gt.f32.partialorder %v1365_v15, 0.0  ;;  %v1429_v16 = vmul.f32 0.2, %v1365_v15 }
  0xef   : > { %v974_v18 = vpop.f32.mrf.mxu2  ;;  %v1266_v19 = vpop.f32.mrf.mxu3 }
  0xf0   : > { %v1461_v22 = vsel %vm1397_vm13, %v1365_v15, %v1429_v16  ;;  %v1038_v23 = vadd.f32 %v974_v18, %v715_v17  ;;  %v492_v24 = vpop.f32.mrf.mxu0  ;;  %v717_v25 = vpop.f32.mrf.mxu1 }
  0xf1   : > { %v1497_v28 = vadd.f32 %v2252_v63, %v1461_v22  ;;  %v718_v32 = vadd.f32 %v717_v25, %v492_v24 }
  0xf2   : > { %v1330_v29 = vadd.f32 %v1266_v19, %v1038_v23  ;;  %1744 = vmatmul.msk.bf16.gmra.mxu0 %vm400_vm1, %v2036_v20 }
  0xf3   : > { %v1529_v30 = vpack.c.bf16 %v1497_v28, %v1497_v28  ;;  %1828 = vmatmul.msk.bf16.gmra.mxu1 %vm400_vm1, %v2019_v21 }
  0xf4   : > { %v1366_v31 = vadd.f32 %v2246_v58, %v1330_v29  ;;  %1914 = vmatmul.msk.bf16.gmra.mxu2 %vm400_vm1, %v2053_v26  ;;  %2000 = vmatmul.msk.bf16.gmra.mxu3 %vm400_vm1, %v2070_v27 }
  0xf5   : > { %1562 = vst.msk [vmem:[%s2263_s27 + $0x28] sm:$0xf] %vm1551_vm3, %v1529_v30 }
  0xf6   : > { %vm1398_vm14 = vcmp.gt.f32.partialorder %v1366_v31, 0.0  ;;  %v1430_v33 = vmul.f32 0.2, %v1366_v31 }
  0xf7   : > { %v977_v34 = vpop.f32.mrf.mxu2  ;;  %v1269_v35 = vpop.f32.mrf.mxu3 }
  0xf8   : > { %v1462_v36 = vsel %vm1398_vm14, %v1366_v31, %v1430_v33  ;;  %v1039_v37 = vadd.f32 %v977_v34, %v718_v32  ;;  %v494_v38 = vpop.f32.mrf.mxu0  ;;  %v719_v39 = vpop.f32.mrf.mxu1 }
  0xf9   : > { %v1498_v40 = vadd.f32 %v2252_v63, %v1462_v36  ;;  %v720_v45 = vadd.f32 %v719_v39, %v494_v38 }
  0xfa   : > { %v1331_v41 = vadd.f32 %v1269_v35, %v1039_v37 }
  0xfb   : > { %v1530_v42 = vpack.c.bf16 %v1498_v40, %v1498_v40 }
  0xfc   : > { %v1367_v43 = vadd.f32 %v2246_v58, %v1331_v41 }
  0xfd   : > { %1563 = vst.msk [vmem:[%s2263_s27 + $0x2c] sm:$0xf] %vm1551_vm3, %v1530_v42 }
  0xfe   : > { %vm1399_vm15 = vcmp.gt.f32.partialorder %v1367_v43, 0.0  ;;  %v1431_v44 = vmul.f32 0.2, %v1367_v43 }
  0xff   : > { %v979_v46 = vpop.f32.mrf.mxu2  ;;  %v1271_v47 = vpop.f32.mrf.mxu3 }
 0x100   : > { %v1463_v50 = vsel %vm1399_vm15, %v1367_v43, %v1431_v44  ;;  %v1040_v51 = vadd.f32 %v979_v46, %v720_v45  ;;  %v497_v52 = vpop.f32.mrf.mxu0  ;;  %v722_v53 = vpop.f32.mrf.mxu1 }
 0x101   : > { %v1499_v56 = vadd.f32 %v2252_v63, %v1463_v50  ;;  %v723_v61 = vadd.f32 %v722_v53, %v497_v52 }
 0x102   : > { %v1332_v57 = vadd.f32 %v1271_v47, %v1040_v51  ;;  %1745 = vmatmul.msk.bf16.gmra.mxu0 %vm400_vm1, %v2037_v48 }
 0x103   : > { %v1531_v59 = vpack.c.bf16 %v1499_v56, %v1499_v56  ;;  %1829 = vmatmul.msk.bf16.gmra.mxu1 %vm400_vm1, %v2020_v49 }
 0x104   : > { %v1368_v60 = vadd.f32 %v2246_v58, %v1332_v57  ;;  %1915 = vmatmul.msk.bf16.gmra.mxu2 %vm400_vm1, %v2054_v54  ;;  %2001 = vmatmul.msk.bf16.gmra.mxu3 %vm400_vm1, %v2071_v55 }
 0x105   : > { %1564 = vst.msk [vmem:[%s2263_s27 + $0x30] sm:$0xf] %vm1551_vm3, %v1531_v59 }
 0x106   : > { %vm1400_vm0 = vcmp.gt.f32.partialorder %v1368_v60, 0.0  ;;  %v1432_v62 = vmul.f32 0.2, %v1368_v60 }
 0x107   : > { %v982_v0 = vpop.f32.mrf.mxu2  ;;  %v1274_v1 = vpop.f32.mrf.mxu3 }
 0x108   : > { %v1464_v2 = vsel %vm1400_vm0, %v1368_v60, %v1432_v62  ;;  %v1041_v3 = vadd.f32 %v982_v0, %v723_v61  ;;  %v499_v4 = vpop.f32.mrf.mxu0  ;;  %v724_v5 = vpop.f32.mrf.mxu1 }
 0x109   : > { %v1500_v6 = vadd.f32 %v2252_v63, %v1464_v2  ;;  %v725_v11 = vadd.f32 %v724_v5, %v499_v4 }
 0x10a   : > { %v1333_v7 = vadd.f32 %v1274_v1, %v1041_v3 }
 0x10b   : > { %v1532_v8 = vpack.c.bf16 %v1500_v6, %v1500_v6 }
 0x10c   : > { %v1369_v9 = vadd.f32 %v2246_v58, %v1333_v7 }
 0x10d   : > { %1565 = vst.msk [vmem:[%s2263_s27 + $0x34] sm:$0xf] %vm1551_vm3, %v1532_v8 }
 0x10e   : > { %vm1401_vm1 = vcmp.gt.f32.partialorder %v1369_v9, 0.0  ;;  %v1433_v10 = vmul.f32 0.2, %v1369_v9 }
 0x10f   : > { %v984_v12 = vpop.f32.mrf.mxu2  ;;  %v1276_v13 = vpop.f32.mrf.mxu3 }
 0x110   : > { %v1465_v14 = vsel %vm1401_vm1, %v1369_v9, %v1433_v10  ;;  %v1042_v15 = vadd.f32 %v984_v12, %v725_v11  ;;  %v502_v16 = vpop.f32.mrf.mxu0  ;;  %v727_v17 = vpop.f32.mrf.mxu1 }
 0x111   : > { %v1501_v18 = vadd.f32 %v2252_v63, %v1465_v14  ;;  %v728_v22 = vadd.f32 %v727_v17, %v502_v16 }
 0x112   : > { %v1334_v19 = vadd.f32 %v1276_v13, %v1042_v15 }
 0x113   : > { %v1533_v20 = vpack.c.bf16 %v1501_v18, %v1501_v18 }
 0x114   : > { %v1370_v21 = vadd.f32 %v2246_v58, %v1334_v19 }
 0x115   : > { %1566 = vst.msk [vmem:[%s2263_s27 + $0x38] sm:$0xf] %vm1551_vm3, %v1533_v20 }
 0x116   : > { %vm1402_vm2 = vcmp.gt.f32.partialorder %v1370_v21, 0.0  ;;  %v1434_v23 = vmul.f32 0.2, %v1370_v21 }
 0x117   : > { %v987_v24 = vpop.f32.mrf.mxu2  ;;  %v1279_v25 = vpop.f32.mrf.mxu3 }
 0x118   : > { %v1466_v26 = vsel %vm1402_vm2, %v1370_v21, %v1434_v23  ;;  %v1043_v27 = vadd.f32 %v987_v24, %v728_v22  ;;  %v504_v28 = vpop.f32.mrf.mxu0  ;;  %v729_v29 = vpop.f32.mrf.mxu1 }
 0x119   : > { %v1502_v30 = vadd.f32 %v2252_v63, %v1466_v26  ;;  %v730_v35 = vadd.f32 %v729_v29, %v504_v28 }
 0x11a   : > { %v1335_v31 = vadd.f32 %v1279_v25, %v1043_v27 }
 0x11b   : > { %v1534_v32 = vpack.c.bf16 %v1502_v30, %v1502_v30 }
 0x11c   : > { %v1371_v33 = vadd.f32 %v2246_v58, %v1335_v31 }
 0x11d   : > { %1567 = vst.msk [vmem:[%s2263_s27 + $0x3c] sm:$0xf] %vm1551_vm3, %v1534_v32 }
 0x11e   : > { %vm1403_vm4 = vcmp.gt.f32.partialorder %v1371_v33, 0.0  ;;  %v1435_v34 = vmul.f32 0.2, %v1371_v33 }
 0x11f   : > { %v989_v36 = vpop.f32.mrf.mxu2  ;;  %v1281_v37 = vpop.f32.mrf.mxu3 }
 0x120   : > { %v1467_v38 = vsel %vm1403_vm4, %v1371_v33, %v1435_v34  ;;  %v1044_v39 = vadd.f32 %v989_v36, %v730_v35  ;;  %v507_v40 = vpop.f32.mrf.mxu0  ;;  %v732_v41 = vpop.f32.mrf.mxu1 }
 0x121   : > { %v1503_v42 = vadd.f32 %v2252_v63, %v1467_v38  ;;  %v733_v46 = vadd.f32 %v732_v41, %v507_v40 }
 0x122   : > { %v1336_v43 = vadd.f32 %v1281_v37, %v1044_v39 }
 0x123   : > { %v1535_v44 = vpack.c.bf16 %v1503_v42, %v1503_v42 }
 0x124   : > { %v1372_v45 = vadd.f32 %v2246_v58, %v1336_v43 }
 0x125   : > { %1568 = vst.msk [vmem:[%s2263_s27 + $0x40] sm:$0xf] %vm1551_vm3, %v1535_v44 }
 0x126   : > { %vm1404_vm5 = vcmp.gt.f32.partialorder %v1372_v45, 0.0  ;;  %v1436_v47 = vmul.f32 0.2, %v1372_v45 }
 0x127   : > { %v992_v48 = vpop.f32.mrf.mxu2  ;;  %v1284_v49 = vpop.f32.mrf.mxu3 }
 0x128   : > { %v1468_v50 = vsel %vm1404_vm5, %v1372_v45, %v1436_v47  ;;  %v1045_v51 = vadd.f32 %v992_v48, %v733_v46  ;;  %v509_v52 = vpop.f32.mrf.mxu0  ;;  %v734_v53 = vpop.f32.mrf.mxu1 }
 0x129   : > { %v1504_v54 = vadd.f32 %v2252_v63, %v1468_v50  ;;  %v735_v60 = vadd.f32 %v734_v53, %v509_v52 }
 0x12a   : > { %v1337_v55 = vadd.f32 %v1284_v49, %v1045_v51 }
 0x12b   : > { %v1536_v56 = vpack.c.bf16 %v1504_v54, %v1504_v54 }
 0x12c   : > { %v1373_v57 = vadd.f32 %v2246_v58, %v1337_v55 }
 0x12d   : > { %1569 = vst.msk [vmem:[%s2263_s27 + $0x44] sm:$0xf] %vm1551_vm3, %v1536_v56 }
 0x12e   : > { %vm1405_vm6 = vcmp.gt.f32.partialorder %v1373_v57, 0.0  ;;  %v1437_v59 = vmul.f32 0.2, %v1373_v57 }
 0x12f   : > { %v994_v61 = vpop.f32.mrf.mxu2  ;;  %v1286_v62 = vpop.f32.mrf.mxu3 }
 0x130   : > { %v1469_v0 = vsel %vm1405_vm6, %v1373_v57, %v1437_v59  ;;  %v1046_v1 = vadd.f32 %v994_v61, %v735_v60  ;;  %v512_v2 = vpop.f32.mrf.mxu0  ;;  %v737_v3 = vpop.f32.mrf.mxu1 }
 0x131   : > { %v1505_v4 = vadd.f32 %v2252_v63, %v1469_v0  ;;  %v738_v8 = vadd.f32 %v737_v3, %v512_v2 }
 0x132   : > { %v1338_v5 = vadd.f32 %v1286_v62, %v1046_v1 }
 0x133   : > { %v1537_v6 = vpack.c.bf16 %v1505_v4, %v1505_v4 }
 0x134   : > { %v1374_v7 = vadd.f32 %v2246_v58, %v1338_v5 }
 0x135   : > { %1570 = vst.msk [vmem:[%s2263_s27 + $0x48] sm:$0xf] %vm1551_vm3, %v1537_v6 }
 0x136   : > { %vm1406_vm7 = vcmp.gt.f32.partialorder %v1374_v7, 0.0  ;;  %v1438_v9 = vmul.f32 0.2, %v1374_v7 }
 0x137   : > { %v997_v10 = vpop.f32.mrf.mxu2  ;;  %v1289_v11 = vpop.f32.mrf.mxu3 }
 0x138   : > { %v1470_v12 = vsel %vm1406_vm7, %v1374_v7, %v1438_v9  ;;  %v1047_v13 = vadd.f32 %v997_v10, %v738_v8  ;;  %v514_v14 = vpop.f32.mrf.mxu0  ;;  %v739_v15 = vpop.f32.mrf.mxu1 }
 0x139   : > { %v1506_v16 = vadd.f32 %v2252_v63, %v1470_v12  ;;  %v740_v21 = vadd.f32 %v739_v15, %v514_v14 }
 0x13a   : > { %v1339_v17 = vadd.f32 %v1289_v11, %v1047_v13 }
 0x13b   : > { %v1538_v18 = vpack.c.bf16 %v1506_v16, %v1506_v16 }
 0x13c   : > { %v1375_v19 = vadd.f32 %v2246_v58, %v1339_v17 }
 0x13d   : > { %1571 = vst.msk [vmem:[%s2263_s27 + $0x4c] sm:$0xf] %vm1551_vm3, %v1538_v18 }
 0x13e   : > { %vm1407_vm8 = vcmp.gt.f32.partialorder %v1375_v19, 0.0  ;;  %v1439_v20 = vmul.f32 0.2, %v1375_v19 }
 0x13f   : > { %v999_v22 = vpop.f32.mrf.mxu2  ;;  %v1291_v23 = vpop.f32.mrf.mxu3 }
 0x140   : > { %v1471_v24 = vsel %vm1407_vm8, %v1375_v19, %v1439_v20  ;;  %v1048_v25 = vadd.f32 %v999_v22, %v740_v21  ;;  %v517_v26 = vpop.f32.mrf.mxu0  ;;  %v742_v27 = vpop.f32.mrf.mxu1 }
 0x141   : > { %v1507_v28 = vadd.f32 %v2252_v63, %v1471_v24  ;;  %v743_v32 = vadd.f32 %v742_v27, %v517_v26 }
 0x142   : > { %v1340_v29 = vadd.f32 %v1291_v23, %v1048_v25 }
 0x143   : > { %v1539_v30 = vpack.c.bf16 %v1507_v28, %v1507_v28 }
 0x144   : > { %v1376_v31 = vadd.f32 %v2246_v58, %v1340_v29 }
 0x145   : > { %1572 = vst.msk [vmem:[%s2263_s27 + $0x50] sm:$0xf] %vm1551_vm3, %v1539_v30 }
 0x146   : > { %vm1408_vm9 = vcmp.gt.f32.partialorder %v1376_v31, 0.0  ;;  %v1440_v33 = vmul.f32 0.2, %v1376_v31 }
 0x147   : > { %v1002_v34 = vpop.f32.mrf.mxu2  ;;  %v1294_v35 = vpop.f32.mrf.mxu3 }
 0x148   : > { %v1472_v36 = vsel %vm1408_vm9, %v1376_v31, %v1440_v33  ;;  %v1049_v37 = vadd.f32 %v1002_v34, %v743_v32  ;;  %v519_v38 = vpop.f32.mrf.mxu0  ;;  %v744_v39 = vpop.f32.mrf.mxu1 }
 0x149   : > { %v1508_v40 = vadd.f32 %v2252_v63, %v1472_v36  ;;  %v745_v45 = vadd.f32 %v744_v39, %v519_v38 }
 0x14a   : > { %v1341_v41 = vadd.f32 %v1294_v35, %v1049_v37 }
 0x14b   : > { %v1540_v42 = vpack.c.bf16 %v1508_v40, %v1508_v40 }
 0x14c   : > { %v1377_v43 = vadd.f32 %v2246_v58, %v1341_v41 }
 0x14d   : > { %1573 = vst.msk [vmem:[%s2263_s27 + $0x54] sm:$0xf] %vm1551_vm3, %v1540_v42 }
 0x14e   : > { %vm1409_vm10 = vcmp.gt.f32.partialorder %v1377_v43, 0.0  ;;  %v1441_v44 = vmul.f32 0.2, %v1377_v43 }
 0x14f   : > { %v1004_v46 = vpop.f32.mrf.mxu2  ;;  %v1296_v47 = vpop.f32.mrf.mxu3 }
 0x150   : > { %v1473_v48 = vsel %vm1409_vm10, %v1377_v43, %v1441_v44  ;;  %v1050_v49 = vadd.f32 %v1004_v46, %v745_v45  ;;  %v522_v50 = vpop.f32.mrf.mxu0  ;;  %v747_v51 = vpop.f32.mrf.mxu1 }
 0x151   : > { %v1509_v52 = vadd.f32 %v2252_v63, %v1473_v48  ;;  %v748_v56 = vadd.f32 %v747_v51, %v522_v50 }
 0x152   : > { %v1342_v53 = vadd.f32 %v1296_v47, %v1050_v49 }
 0x153   : > { %v1541_v54 = vpack.c.bf16 %v1509_v52, %v1509_v52 }
 0x154   : > { %v1378_v55 = vadd.f32 %v2246_v58, %v1342_v53 }
 0x155   : > { %1574 = vst.msk [vmem:[%s2263_s27 + $0x58] sm:$0xf] %vm1551_vm3, %v1541_v54 }
 0x156   : > { %vm1410_vm11 = vcmp.gt.f32.partialorder %v1378_v55, 0.0  ;;  %v1442_v57 = vmul.f32 0.2, %v1378_v55 }
 0x157   : > { %v1007_v59 = vpop.f32.mrf.mxu2  ;;  %v1299_v60 = vpop.f32.mrf.mxu3 }
 0x158   : > { %v1474_v61 = vsel %vm1410_vm11, %v1378_v55, %v1442_v57  ;;  %v1051_v62 = vadd.f32 %v1007_v59, %v748_v56  ;;  %v524_v0 = vpop.f32.mrf.mxu0  ;;  %v749_v1 = vpop.f32.mrf.mxu1 }
 0x159   : > { %v1510_v2 = vadd.f32 %v2252_v63, %v1474_v61  ;;  %v750_v7 = vadd.f32 %v749_v1, %v524_v0 }
 0x15a   : > { %v1343_v3 = vadd.f32 %v1299_v60, %v1051_v62 }
 0x15b   : > { %v1542_v4 = vpack.c.bf16 %v1510_v2, %v1510_v2 }
 0x15c   : > { %v1379_v5 = vadd.f32 %v2246_v58, %v1343_v3 }
 0x15d   : > { %1575 = vst.msk [vmem:[%s2263_s27 + $0x5c] sm:$0xf] %vm1551_vm3, %v1542_v4 }
 0x15e   : > { %vm1411_vm12 = vcmp.gt.f32.partialorder %v1379_v5, 0.0  ;;  %v1443_v6 = vmul.f32 0.2, %v1379_v5 }
 0x15f   : > { %v1009_v8 = vpop.f32.mrf.mxu2  ;;  %v1301_v9 = vpop.f32.mrf.mxu3 }
 0x160   : > { %v1475_v10 = vsel %vm1411_vm12, %v1379_v5, %v1443_v6  ;;  %v1052_v11 = vadd.f32 %v1009_v8, %v750_v7  ;;  %v527_v12 = vpop.f32.mrf.mxu0  ;;  %v752_v13 = vpop.f32.mrf.mxu1 }
 0x161   : > { %v1511_v14 = vadd.f32 %v2252_v63, %v1475_v10  ;;  %v753_v18 = vadd.f32 %v752_v13, %v527_v12 }
 0x162   : > { %v1344_v15 = vadd.f32 %v1301_v9, %v1052_v11 }
 0x163   : > { %v1543_v16 = vpack.c.bf16 %v1511_v14, %v1511_v14 }
 0x164   : > { %v1380_v17 = vadd.f32 %v2246_v58, %v1344_v15 }
 0x165   : > { %1576 = vst.msk [vmem:[%s2263_s27 + $0x60] sm:$0xf] %vm1551_vm3, %v1543_v16 }
 0x166   : > { %vm1412_vm13 = vcmp.gt.f32.partialorder %v1380_v17, 0.0  ;;  %v1444_v19 = vmul.f32 0.2, %v1380_v17 }
 0x167   : > { %v1012_v20 = vpop.f32.mrf.mxu2  ;;  %v1304_v21 = vpop.f32.mrf.mxu3 }
 0x168   : > { %v1476_v22 = vsel %vm1412_vm13, %v1380_v17, %v1444_v19  ;;  %v1053_v23 = vadd.f32 %v1012_v20, %v753_v18  ;;  %v529_v24 = vpop.f32.mrf.mxu0  ;;  %v754_v25 = vpop.f32.mrf.mxu1 }
 0x169   : > { %v1512_v26 = vadd.f32 %v2252_v63, %v1476_v22  ;;  %v755_v31 = vadd.f32 %v754_v25, %v529_v24 }
 0x16a   : > { %v1345_v27 = vadd.f32 %v1304_v21, %v1053_v23 }
 0x16b   : > { %v1544_v28 = vpack.c.bf16 %v1512_v26, %v1512_v26 }
 0x16c   : > { %v1381_v29 = vadd.f32 %v2246_v58, %v1345_v27 }
 0x16d   : > { %1577 = vst.msk [vmem:[%s2263_s27 + $0x64] sm:$0xf] %vm1551_vm3, %v1544_v28 }
 0x16e   : > { %vm1413_vm14 = vcmp.gt.f32.partialorder %v1381_v29, 0.0  ;;  %v1445_v30 = vmul.f32 0.2, %v1381_v29 }
 0x16f   : > { %v1014_v32 = vpop.f32.mrf.mxu2  ;;  %v1306_v33 = vpop.f32.mrf.mxu3 }
 0x170   : > { %v1477_v34 = vsel %vm1413_vm14, %v1381_v29, %v1445_v30  ;;  %v1054_v35 = vadd.f32 %v1014_v32, %v755_v31  ;;  %v532_v36 = vpop.f32.mrf.mxu0  ;;  %v757_v37 = vpop.f32.mrf.mxu1 }
 0x171   : > { %v1513_v38 = vadd.f32 %v2252_v63, %v1477_v34  ;;  %v758_v42 = vadd.f32 %v757_v37, %v532_v36 }
 0x172   : > { %v1346_v39 = vadd.f32 %v1306_v33, %v1054_v35 }
 0x173   : > { %v1545_v40 = vpack.c.bf16 %v1513_v38, %v1513_v38 }
 0x174   : > { %v1382_v41 = vadd.f32 %v2246_v58, %v1346_v39 }
 0x175   : > { %1578 = vst.msk [vmem:[%s2263_s27 + $0x68] sm:$0xf] %vm1551_vm3, %v1545_v40 }
 0x176   : > { %vm1414_vm15 = vcmp.gt.f32.partialorder %v1382_v41, 0.0  ;;  %v1446_v43 = vmul.f32 0.2, %v1382_v41 }
 0x177   : > { %v1017_v44 = vpop.f32.mrf.mxu2  ;;  %v1309_v45 = vpop.f32.mrf.mxu3 }
 0x178   : > { %v1478_v46 = vsel %vm1414_vm15, %v1382_v41, %v1446_v43  ;;  %v1055_v47 = vadd.f32 %v1017_v44, %v758_v42  ;;  %v534_v48 = vpop.f32.mrf.mxu0  ;;  %v759_v49 = vpop.f32.mrf.mxu1 }
 0x179   : > { %v1514_v50 = vadd.f32 %v2252_v63, %v1478_v46  ;;  %v760_v55 = vadd.f32 %v759_v49, %v534_v48 }
 0x17a   : > { %v1347_v51 = vadd.f32 %v1309_v45, %v1055_v47 }
 0x17b   : > { %v1546_v52 = vpack.c.bf16 %v1514_v50, %v1514_v50 }
 0x17c   : > { %v1383_v53 = vadd.f32 %v2246_v58, %v1347_v51 }
 0x17d   : > { %1579 = vst.msk [vmem:[%s2263_s27 + $0x6c] sm:$0xf] %vm1551_vm3, %v1546_v52 }
 0x17e   : > { %vm1415_vm0 = vcmp.gt.f32.partialorder %v1383_v53, 0.0  ;;  %v1447_v54 = vmul.f32 0.2, %v1383_v53 }
 0x17f   : > { %v1019_v56 = vpop.f32.mrf.mxu2  ;;  %v1311_v57 = vpop.f32.mrf.mxu3 }
 0x180   : > { %v1479_v59 = vsel %vm1415_vm0, %v1383_v53, %v1447_v54  ;;  %v1056_v60 = vadd.f32 %v1019_v56, %v760_v55  ;;  %v537_v62 = vpop.f32.mrf.mxu0  ;;  %v762_v0 = vpop.f32.mrf.mxu1 }
 0x181   : > { %v1515_v61 = vadd.f32 %v2252_v63, %v1479_v59  ;;  %v763_v4 = vadd.f32 %v762_v0, %v537_v62 }
 0x182   : > { %v1348_v1 = vadd.f32 %v1311_v57, %v1056_v60 }
 0x183   : > { %v1547_v2 = vpack.c.bf16 %v1515_v61, %v1515_v61 }
 0x184   : > { %v1384_v3 = vadd.f32 %v2246_v58, %v1348_v1 }
 0x185   : > { %1580 = vst.msk [vmem:[%s2263_s27 + $0x70] sm:$0xf] %vm1551_vm3, %v1547_v2 }
 0x186   : > { %vm1416_vm1 = vcmp.gt.f32.partialorder %v1384_v3, 0.0  ;;  %v1448_v5 = vmul.f32 0.2, %v1384_v3 }
 0x187   : > { %v1022_v6 = vpop.f32.mrf.mxu2  ;;  %v1314_v7 = vpop.f32.mrf.mxu3 }
 0x188   : > { %v1480_v8 = vsel %vm1416_vm1, %v1384_v3, %v1448_v5  ;;  %v1057_v9 = vadd.f32 %v1022_v6, %v763_v4  ;;  %v539_v13 = vpop.f32.mrf.mxu0  ;;  %v764_v14 = vpop.f32.mrf.mxu1 }
 0x189   : > { %v1516_v10 = vadd.f32 %v2252_v63, %v1480_v8  ;;  %v765_v17 = vadd.f32 %v764_v14, %v539_v13 }
 0x18a   : > { %v1349_v11 = vadd.f32 %v1314_v7, %v1057_v9 }
 0x18b   : > { %v1548_v12 = vpack.c.bf16 %v1516_v10, %v1516_v10 }
 0x18c   : > { %v1385_v15 = vadd.f32 %v2246_v58, %v1349_v11 }
 0x18d   : > { %1581 = vst.msk [vmem:[%s2263_s27 + $0x74] sm:$0xf] %vm1551_vm3, %v1548_v12 }
 0x18e   : > { %vm1417_vm2 = vcmp.gt.f32.partialorder %v1385_v15, 0.0  ;;  %v1449_v16 = vmul.f32 0.2, %v1385_v15 }
 0x18f   : > { %v1024_v18 = vpop.f32.mrf.mxu2  ;;  %v1316_v22 = vpop.f32.mrf.mxu3 }
 0x190   : > { %v1481_v19 = vsel %vm1417_vm2, %v1385_v15, %v1449_v16  ;;  %v1058_v20 = vadd.f32 %v1024_v18, %v765_v17 }
 0x191   : > { %v1517_v21 = vadd.f32 %v2252_v63, %v1481_v19 }
 0x192   : > { %v1350_v23 = vadd.f32 %v1316_v22, %v1058_v20 }
 0x193   : > { %v1549_v24 = vpack.c.bf16 %v1517_v21, %v1517_v21 }
 0x194   : > { %v1386_v25 = vadd.f32 %v2246_v58, %v1350_v23 }
 0x195   : > { %1582 = vst.msk [vmem:[%s2263_s27 + $0x78] sm:$0xf] %vm1551_vm3, %v1549_v24 }
 0x196   : > { %vm1418_vm4 = vcmp.gt.f32.partialorder %v1386_v25, 0.0  ;;  %v1450_v26 = vmul.f32 0.2, %v1386_v25 }
 0x198   : > { %v1482_v27 = vsel %vm1418_vm4, %v1386_v25, %v1450_v26 }
 0x199   : > { %v1518_v28 = vadd.f32 %v2252_v63, %v1482_v27 }
 0x19b   : > { %v1550_v29 = vpack.c.bf16 %v1518_v28, %v1518_v28 }
 0x19d   : > { %1583 = vst.msk [vmem:[%s2263_s27 + $0x7c] sm:$0xf] %vm1551_vm3, %v1550_v29 }
 0x19e PF: > { %s15_s18 = sadd.s32 1, %s2090_s18  }
 0x19f   : > { %p12_p4 = scmp.ge.s32.totalorder %s15_s18, 5  }
 0x1a1   :  { %14 = sbr.rel (!%p12_p4) target bundleno = 1 (0x1), region = 76 }

// kernel: discriminator_forward.6
= control target key start
LH: loop header
LB: loop body
LE: loop exit
PB: predicated region body
PF: predicated region fallthrough
CT: control target
= control target key end

     0   :  { %s1063_s18 = smov 0   ;;  %s1215_s0 = inlined_call_operand.vmem [shape: bf16[3,72,64], index: 0, kind: input, shape index: {}]   ;;  %s1216_s1 = inlined_call_operand.vmem [shape: bf16[3,72,64], index: 1, kind: input, shape index: {}]   ;;  %s1217_s2 = inlined_call_operand.vmem [shape: bf16[4,64,32], index: 2, kind: input, shape index: {}]   ;;  %s1218_s3 = inlined_call_operand.vmem [shape: f32[1,32], index: 3, kind: input, shape index: {}]   ;;  %s1219_s4 = inlined_call_operand.vmem [shape: f32[1,32], index: 4, kind: input, shape index: {}]   ;;  %s1220_s5 = inlined_call_operand.vmem [shape: bf16[3,64,32], index: 5, kind: output, shape index: {}]  }
   0x1 LB: > { %s802_s19 = sadd.s32 4294967295, %s1031_s18   ;;  %p806_p0 = scmp.ge.s32.totalorder %s1031_s18, 1  ;;  %s1031_s18 = sphi %s1063_s18, %s15_s18  }
   0x2   : > { %p197_p1 = scmp.lt.s32.totalorder %s1031_s18, 4 }
   0x4   : > { %p198_p2 = pnand %p806_p0, %p197_p1 }
   0x5   : > { %p230_p3 = scmp.lt.s32.totalorder (!%p198_p2), %s802_s19, 2 }
   0x6   : > { %201 = sbr.rel (%p198_p2) target bundleno = 231 (0xe7), region = 40 }
   0xb   : > { %v997_v0 = vld [vmem:[%s1217_s2 + $0x38] sm:$0xff]  ;;  %v996_v4 = vld [vmem:[%s1217_s2 + $0x30] sm:$0xff]  ;;  %s1222_s19 = smov (!%p230_p3, %s802_s19), 2  ;;  %v995_v8 = vld [vmem:[%s1217_s2 + $0x28] sm:$0xff]  ;;  %vm323_vm0 = vcmask 523264   ;;  %vm726_vm2 = vcmask 257024  }
   0xc   : > { %v989_v1 = vld [vmem:[%s1217_s2 + $0x18] sm:$0xff]  ;;  %340 = vmatpush.bf16.msra.mxu0 %v997_v0  ;;  %v988_v5 = vld [vmem:[%s1217_s2 + $0x10] sm:$0xff]  ;;  %v987_v9 = vld [vmem:[%s1217_s2 + $0x8] sm:$0xff]  ;;  %s1014_s15 = smul.u32 36, %s1222_s19 }
   0xd   : > { %v1005_v2 = vld [vmem:[%s1217_s2 + $0x58] sm:$0xff]  ;;  %425 = vmatpush.bf16.msra.mxu1 %v989_v1  ;;  %v1004_v6 = vld [vmem:[%s1217_s2 + $0x50] sm:$0xff]  ;;  %v1003_v10 = vld [vmem:[%s1217_s2 + $0x48] sm:$0xff] }
   0xe   : > { %v1013_v3 = vld [vmem:[%s1217_s2 + $0x78] sm:$0xff]  ;;  %527 = vmatpush.bf16.msra.mxu2 %v1005_v2  ;;  %v1012_v7 = vld [vmem:[%s1217_s2 + $0x70] sm:$0xff]  ;;  %v1011_v11 = vld [vmem:[%s1217_s2 + $0x68] sm:$0xff]  ;;  %s1119_s28 = scalar_lea.vmem %s1216_s1, %s1014_s15  ;;  %s1124_s6 = scalar_lea.vmem %s1215_s0, %s1014_s15 }
   0xf   : > { %637 = vmatpush.bf16.msra.mxu3 %v1013_v3  ;;  %v994_v12 = vld [vmem:[%s1217_s2 + $0x20] sm:$0xff]  ;;  %v991_v20 = vld [vmem:[%s1119_s28 + $0x8] sm:$0xff]  ;;  %v992_v24 = vld [vmem:[%s1119_s28 + $0x10] sm:$0xff]  ;;  %s981_s15 = sshll.u32 %s1222_s19, 5 }
  0x10   : > { %341 = vmatpush.bf16.msra.mxu0 %v996_v4  ;;  %v986_v13 = vld [vmem:[%s1217_s2] sm:$0xff]  ;;  %v983_v21 = vld [vmem:[%s1124_s6 + $0x8] sm:$0xff]  ;;  %v984_v25 = vld [vmem:[%s1124_s6 + $0x10] sm:$0xff]  ;;  %s1180_s20 = scalar_lea.vmem %s1220_s5, %s981_s15 }
  0x11   : > { %426 = vmatpush.bf16.msra.mxu1 %v988_v5  ;;  %v1002_v14 = vld [vmem:[%s1217_s2 + $0x40] sm:$0xff]  ;;  %v999_v22 = vld [vmem:[%s1124_s6 + $0xc] sm:$0xff]  ;;  %v1000_v26 = vld [vmem:[%s1124_s6 + $0x14] sm:$0xff] }
  0x12   : > { %528 = vmatpush.bf16.msra.mxu2 %v1004_v6  ;;  %v1010_v15 = vld [vmem:[%s1217_s2 + $0x60] sm:$0xff]  ;;  %v1007_v23 = vld [vmem:[%s1119_s28 + $0xc] sm:$0xff]  ;;  %v1008_v27 = vld [vmem:[%s1119_s28 + $0x14] sm:$0xff] }
  0x13   : > { %638 = vmatpush.bf16.msra.mxu3 %v1012_v7  ;;  %v990_v16 = vld [vmem:[%s1119_s28] sm:$0xff]  ;;  %v993_v28 = vld [vmem:[%s1119_s28 + $0x18] sm:$0xff] }
  0x14   : > { %342 = vmatpush.bf16.msra.mxu0 %v995_v8  ;;  %v982_v17 = vld [vmem:[%s1124_s6] sm:$0xff]  ;;  %v985_v29 = vld [vmem:[%s1124_s6 + $0x18] sm:$0xff] }
  0x15   : > { %427 = vmatpush.bf16.msra.mxu1 %v987_v9  ;;  %v998_v18 = vld [vmem:[%s1124_s6 + $0x4] sm:$0xff]  ;;  %v1001_v30 = vld [vmem:[%s1124_s6 + $0x1c] sm:$0xff] }
  0x16   : > { %529 = vmatpush.bf16.msra.mxu2 %v1003_v10  ;;  %v1006_v19 = vld [vmem:[%s1119_s28 + $0x4] sm:$0xff]  ;;  %v1009_v31 = vld [vmem:[%s1119_s28 + $0x1c] sm:$0xff] }
  0x17   : > { %639 = vmatpush.bf16.msra.mxu3 %v1011_v11  ;;  %v1167_v38 = vld [vmem:[%s1218_s3] ss:$0 sm:$0xff] }
  0x18   : > { %343 = vmatpush.bf16.msra.mxu0 %v994_v12  ;;  %v1173_v43 = vld [vmem:[%s1219_s4] ss:$0 sm:$0xff] }
  0x19   : > { %428 = vmatpush.bf16.msra.mxu1 %v986_v13 }
  0x1a   : > { %530 = vmatpush.bf16.msra.mxu2 %v1002_v14 }
  0x1b   : > { %640 = vmatpush.bf16.msra.mxu3 %v1010_v15  ;;  %851 = vmatmul.msk.bf16.vlgmr.msra.gmra.mxu0 %vm323_vm0, %v990_v16 }
  0x1c   : > { %887 = vmatmul.msk.bf16.vlgmr.msra.gmra.mxu1 %vm323_vm0, %v982_v17 }
  0x1d   : > { %931 = vmatmul.msk.bf16.vlgmr.msra.gmra.mxu2 %vm323_vm0, %v998_v18 }
  0x1e   : > { %975 = vmatmul.msk.bf16.vlgmr.msra.gmra.mxu3 %vm323_vm0, %v1006_v19 }
  0x2b   : > { %852 = vmatmul.msk.bf16.gmra.mxu0 %vm323_vm0, %v991_v20 }
  0x2c   : > { %888 = vmatmul.msk.bf16.gmra.mxu1 %vm323_vm0, %v983_v21 }
  0x2d   : > { %932 = vmatmul.msk.bf16.gmra.mxu2 %vm323_vm0, %v999_v22 }
  0x2e   : > { %976 = vmatmul.msk.bf16.gmra.mxu3 %vm323_vm0, %v1007_v23 }
  0x3b   : > { %853 = vmatmul.msk.bf16.gmra.mxu0 %vm323_vm0, %v992_v24 }
  0x3c   : > { %889 = vmatmul.msk.bf16.gmra.mxu1 %vm323_vm0, %v984_v25 }
  0x3d   : > { %933 = vmatmul.msk.bf16.gmra.mxu2 %vm323_vm0, %v1000_v26 }
  0x3e   : > { %977 = vmatmul.msk.bf16.gmra.mxu3 %vm323_vm0, %v1008_v27 }
  0x4b   : > { %854 = vmatmul.msk.bf16.gmra.mxu0 %vm323_vm0, %v993_v28 }
  0x4c   : > { %890 = vmatmul.msk.bf16.gmra.mxu1 %vm323_vm0, %v985_v29 }
  0x4d   : > { %934 = vmatmul.msk.bf16.gmra.mxu2 %vm323_vm0, %v1001_v30 }
  0x4e   : > { %978 = vmatmul.msk.bf16.gmra.mxu3 %vm323_vm0, %v1009_v31 }
  0x98   : > { %v345_v32 = vpop.f32.mrf.mxu0 }
  0x99   : > { %v430_v33 = vpop.f32.mrf.mxu1 }
  0x9a   : > { %v431_v34 = vadd.f32 %v430_v33, %v345_v32 }
  0xa0   : > { %v532_v35 = vpop.f32.mrf.mxu2  ;;  %v347_v39 = vpop.f32.mrf.mxu0 }
  0xa1   : > { %v642_v36 = vpop.f32.mrf.mxu3  ;;  %v552_v37 = vadd.f32 %v532_v35, %v431_v34  ;;  %v432_v40 = vpop.f32.mrf.mxu1 }
  0xa2   : > { %v433_v45 = vadd.f32 %v432_v40, %v347_v39 }
  0xa3   : > { %v662_v41 = vadd.f32 %v642_v36, %v552_v37 }
  0xa5   : > { %v674_v42 = vadd.f32 %v1167_v38, %v662_v41 }
  0xa7   : > { %vm682_vm1 = vcmp.gt.f32.partialorder %v674_v42, 0.0  ;;  %v690_v44 = vmul.f32 0.2, %v674_v42 }
  0xa8   : > { %v534_v46 = vpop.f32.mrf.mxu2  ;;  %v350_v50 = vpop.f32.mrf.mxu0 }
  0xa9   : > { %v644_v47 = vpop.f32.mrf.mxu3  ;;  %v698_v48 = vsel %vm682_vm1, %v674_v42, %v690_v44  ;;  %v553_v49 = vadd.f32 %v534_v46, %v433_v45  ;;  %v435_v51 = vpop.f32.mrf.mxu1 }
  0xaa   : > { %v710_v52 = vadd.f32 %v1173_v43, %v698_v48  ;;  %v436_v56 = vadd.f32 %v435_v51, %v350_v50 }
  0xab   : > { %v663_v53 = vadd.f32 %v644_v47, %v553_v49 }
  0xac   : > { %v718_v54 = vpack.c.bf16 %v710_v52, %v710_v52 }
  0xad   : > { %v675_v55 = vadd.f32 %v1167_v38, %v663_v53 }
  0xae   : > { %727 = vst.msk [vmem:[%s1180_s20] sm:$0xf] %vm726_vm2, %v718_v54 }
  0xaf   : > { %vm683_vm3 = vcmp.gt.f32.partialorder %v675_v55, 0.0  ;;  %v691_v57 = vmul.f32 0.2, %v675_v55 }
  0xb0   : > { %v537_v58 = vpop.f32.mrf.mxu2  ;;  %v352_v62 = vpop.f32.mrf.mxu0 }
  0xb1   : > { %v647_v59 = vpop.f32.mrf.mxu3  ;;  %v699_v60 = vsel %vm683_vm3, %v675_v55, %v691_v57  ;;  %v554_v61 = vadd.f32 %v537_v58, %v436_v56  ;;  %v437_v63 = vpop.f32.mrf.mxu1 }
  0xb2   : > { %v711_v0 = vadd.f32 %v1173_v43, %v699_v60  ;;  %v438_v5 = vadd.f32 %v437_v63, %v352_v62 }
  0xb3   : > { %v664_v1 = vadd.f32 %v647_v59, %v554_v61 }
  0xb4   : > { %v719_v2 = vpack.c.bf16 %v711_v0, %v711_v0 }
  0xb5   : > { %v676_v3 = vadd.f32 %v1167_v38, %v664_v1 }
  0xb6   : > { %728 = vst.msk [vmem:[%s1180_s20 + $0x4] sm:$0xf] %vm726_vm2, %v719_v2 }
  0xb7   : > { %vm684_vm4 = vcmp.gt.f32.partialorder %v676_v3, 0.0  ;;  %v692_v4 = vmul.f32 0.2, %v676_v3 }
  0xb8   : > { %v539_v6 = vpop.f32.mrf.mxu2  ;;  %v355_v10 = vpop.f32.mrf.mxu0 }
  0xb9   : > { %v649_v7 = vpop.f32.mrf.mxu3  ;;  %v700_v8 = vsel %vm684_vm4, %v676_v3, %v692_v4  ;;  %v555_v9 = vadd.f32 %v539_v6, %v438_v5  ;;  %v440_v11 = vpop.f32.mrf.mxu1 }
  0xba   : > { %v712_v12 = vadd.f32 %v1173_v43, %v700_v8  ;;  %v441_v16 = vadd.f32 %v440_v11, %v355_v10 }
  0xbb   : > { %v665_v13 = vadd.f32 %v649_v7, %v555_v9 }
  0xbc   : > { %v720_v14 = vpack.c.bf16 %v712_v12, %v712_v12 }
  0xbd   : > { %v677_v15 = vadd.f32 %v1167_v38, %v665_v13 }
  0xbe   : > { %729 = vst.msk [vmem:[%s1180_s20 + $0x8] sm:$0xf] %vm726_vm2, %v720_v14 }
  0xbf   : > { %vm685_vm5 = vcmp.gt.f32.partialorder %v677_v15, 0.0  ;;  %v693_v17 = vmul.f32 0.2, %v677_v15 }
  0xc0   : > { %v542_v18 = vpop.f32.mrf.mxu2  ;;  %v357_v22 = vpop.f32.mrf.mxu0 }
  0xc1   : > { %v652_v19 = vpop.f32.mrf.mxu3  ;;  %v701_v20 = vsel %vm685_vm5, %v677_v15, %v693_v17  ;;  %v556_v21 = vadd.f32 %v542_v18, %v441_v16  ;;  %v442_v23 = vpop.f32.mrf.mxu1 }
  0xc2   : > { %v713_v24 = vadd.f32 %v1173_v43, %v701_v20  ;;  %v443_v29 = vadd.f32 %v442_v23, %v357_v22 }
  0xc3   : > { %v666_v25 = vadd.f32 %v652_v19, %v556_v21 }
  0xc4   : > { %v721_v26 = vpack.c.bf16 %v713_v24, %v713_v24 }
  0xc5   : > { %v678_v27 = vadd.f32 %v1167_v38, %v666_v25 }
  0xc6   : > { %730 = vst.msk [vmem:[%s1180_s20 + $0xc] sm:$0xf] %vm726_vm2, %v721_v26 }
  0xc7   : > { %vm686_vm6 = vcmp.gt.f32.partialorder %v678_v27, 0.0  ;;  %v694_v28 = vmul.f32 0.2, %v678_v27 }
  0xc8   : > { %v544_v30 = vpop.f32.mrf.mxu2  ;;  %v360_v35 = vpop.f32.mrf.mxu0 }
  0xc9   : > { %v654_v31 = vpop.f32.mrf.mxu3  ;;  %v702_v32 = vsel %vm686_vm6, %v678_v27, %v694_v28  ;;  %v557_v33 = vadd.f32 %v544_v30, %v443_v29  ;;  %v445_v36 = vpop.f32.mrf.mxu1 }
  0xca   : > { %v714_v34 = vadd.f32 %v1173_v43, %v702_v32  ;;  %v446_v41 = vadd.f32 %v445_v36, %v360_v35 }
  0xcb   : > { %v667_v37 = vadd.f32 %v654_v31, %v557_v33 }
  0xcc   : > { %v722_v39 = vpack.c.bf16 %v714_v34, %v714_v34 }
  0xcd   : > { %v679_v40 = vadd.f32 %v1167_v38, %v667_v37 }
  0xce   : > { %731 = vst.msk [vmem:[%s1180_s20 + $0x10] sm:$0xf] %vm726_vm2, %v722_v39 }
  0xcf   : > { %vm687_vm7 = vcmp.gt.f32.partialorder %v679_v40, 0.0  ;;  %v695_v42 = vmul.f32 0.2, %v679_v40 }
  0xd0   : > { %v547_v44 = vpop.f32.mrf.mxu2  ;;  %v362_v51 = vpop.f32.mrf.mxu0 }
  0xd1   : > { %v657_v45 = vpop.f32.mrf.mxu3  ;;  %v703_v46 = vsel %vm687_vm7, %v679_v40, %v695_v42  ;;  %v558_v47 = vadd.f32 %v547_v44, %v446_v41  ;;  %v447_v52 = vpop.f32.mrf.mxu1 }
  0xd2   : > { %v715_v48 = vadd.f32 %v1173_v43, %v703_v46  ;;  %v448_v55 = vadd.f32 %v447_v52, %v362_v51 }
  0xd3   : > { %v668_v49 = vadd.f32 %v657_v45, %v558_v47 }
  0xd4   : > { %v723_v50 = vpack.c.bf16 %v715_v48, %v715_v48 }
  0xd5   : > { %v680_v53 = vadd.f32 %v1167_v38, %v668_v49 }
  0xd6   : > { %732 = vst.msk [vmem:[%s1180_s20 + $0x14] sm:$0xf] %vm726_vm2, %v723_v50 }
  0xd7   : > { %vm688_vm8 = vcmp.gt.f32.partialorder %v680_v53, 0.0  ;;  %v696_v54 = vmul.f32 0.2, %v680_v53 }
  0xd8   : > { %v549_v56 = vpop.f32.mrf.mxu2 }
  0xd9   : > { %v704_v57 = vsel %vm688_vm8, %v680_v53, %v696_v54  ;;  %v559_v58 = vadd.f32 %v549_v56, %v448_v55  ;;  %v659_v60 = vpop.f32.mrf.mxu3 }
  0xda   : > { %v716_v59 = vadd.f32 %v1173_v43, %v704_v57 }
  0xdb   : > { %v669_v61 = vadd.f32 %v659_v60, %v559_v58 }
  0xdc   : > { %v724_v62 = vpack.c.bf16 %v716_v59, %v716_v59 }
  0xdd   : > { %v681_v63 = vadd.f32 %v1167_v38, %v669_v61 }
  0xde   : > { %733 = vst.msk [vmem:[%s1180_s20 + $0x18] sm:$0xf] %vm726_vm2, %v724_v62 }
  0xdf   : > { %vm689_vm9 = vcmp.gt.f32.partialorder %v681_v63, 0.0  ;;  %v697_v0 = vmul.f32 0.2, %v681_v63 }
  0xe1   : > { %v705_v1 = vsel %vm689_vm9, %v681_v63, %v697_v0 }
  0xe2   : > { %v717_v2 = vadd.f32 %v1173_v43, %v705_v1 }
  0xe4   : > { %v725_v3 = vpack.c.bf16 %v717_v2, %v717_v2 }
  0xe6   : > { %734 = vst.msk [vmem:[%s1180_s20 + $0x1c] sm:$0xf] %vm726_vm2, %v725_v3 }
  0xe7 PF: > { %s15_s18 = sadd.s32 1, %s1031_s18  }
  0xe8   : > { %p12_p4 = scmp.ge.s32.totalorder %s15_s18, 5  }
  0xea   :  { %14 = sbr.rel (!%p12_p4) target bundleno = 1 (0x1), region = 76 }

// kernel: discriminator_forward.7
= control target key start
LH: loop header
LB: loop body
LE: loop exit
PB: predicated region body
PF: predicated region fallthrough
CT: control target
= control target key end

     0   :  { %s990_s18 = smov 0   ;;  %s1128_s0 = inlined_call_operand.vmem [shape: bf16[3,20,128], index: 0, kind: input, shape index: {}]   ;;  %s1129_s1 = inlined_call_operand.vmem [shape: bf16[3,20,128], index: 1, kind: input, shape index: {}]   ;;  %s1130_s2 = inlined_call_operand.vmem [shape: bf16[4,128,64], index: 2, kind: input, shape index: {}]   ;;  %s1131_s3 = inlined_call_operand.vmem [shape: f32[1,64], index: 3, kind: input, shape index: {}]   ;;  %s1132_s4 = inlined_call_operand.vmem [shape: f32[1,64], index: 4, kind: input, shape index: {}]   ;;  %s1133_s5 = inlined_call_operand.vmem [shape: bf16[3,16,64], index: 5, kind: output, shape index: {}]  }
   0x1 LB: > { %s701_s19 = sadd.s32 4294967295, %s958_s18   ;;  %p705_p0 = scmp.ge.s32.totalorder %s958_s18, 1  ;;  %s958_s18 = sphi %s990_s18, %s15_s18  }
   0x2   : > { %p197_p1 = scmp.lt.s32.totalorder %s958_s18, 4 }
   0x4   : > { %p198_p2 = pnand %p705_p0, %p197_p1 }
   0x5   : > { %p230_p3 = scmp.lt.s32.totalorder (!%p198_p2), %s701_s19, 2 }
   0x6   : > { %201 = sbr.rel (%p198_p2) target bundleno = 199 (0xc7), region = 40 }
   0xb   : > { %v922_v0 = vld [vmem:[%s1130_s2 + $0x78] sm:$0xff]  ;;  %v921_v4 = vld [vmem:[%s1130_s2 + $0x70] sm:$0xff]  ;;  %s1135_s19 = smov (!%p230_p3, %s701_s19), 2  ;;  %v920_v8 = vld [vmem:[%s1130_s2 + $0x68] sm:$0xff]  ;;  %vm446_vm0 = vcmask 1045504   ;;  %vm631_vm2 = vcmask 519168  }
   0xc   : > { %v913_v1 = vld [vmem:[%s1130_s2 + $0x38] sm:$0xff]  ;;  %336 = vmatpush.bf16.msra.mxu0 %v922_v0  ;;  %v912_v5 = vld [vmem:[%s1130_s2 + $0x30] sm:$0xff]  ;;  %v911_v9 = vld [vmem:[%s1130_s2 + $0x28] sm:$0xff]  ;;  %s941_s21 = smul.u32 12, %s1135_s19  ;;  %s904_s26 = sshll.u32 %s1135_s19, 3 }
   0xd   : > { %v931_v2 = vld [vmem:[%s1130_s2 + $0xb8] sm:$0xff]  ;;  %404 = vmatpush.bf16.msra.mxu1 %v913_v1  ;;  %v930_v6 = vld [vmem:[%s1130_s2 + $0xb0] sm:$0xff]  ;;  %v929_v10 = vld [vmem:[%s1130_s2 + $0xa8] sm:$0xff]  ;;  %s244_s29 = scalar_lea.vmem %s1133_s5, %s904_s26 }
   0xe   : > { %v940_v3 = vld [vmem:[%s1130_s2 + $0xf8] sm:$0xff]  ;;  %499 = vmatpush.bf16.msra.mxu2 %v931_v2  ;;  %v939_v7 = vld [vmem:[%s1130_s2 + $0xf0] sm:$0xff]  ;;  %v938_v11 = vld [vmem:[%s1130_s2 + $0xe8] sm:$0xff]  ;;  %s1052_s7 = scalar_lea.vmem %s1129_s1, %s941_s21  ;;  %s1057_s10 = scalar_lea.vmem %s1128_s0, %s941_s21 }
   0xf   : > { %595 = vmatpush.bf16.msra.mxu3 %v940_v3  ;;  %v919_v12 = vld [vmem:[%s1130_s2 + $0x60] sm:$0xff]  ;;  %v918_v16 = vld [vmem:[%s1130_s2 + $0x58] sm:$0xff]  ;;  %v420_v20 = vld [vmem:[%s1057_s10 + $0x8] sm:$0x3] }
  0x10   : > { %337 = vmatpush.bf16.msra.mxu0 %v921_v4  ;;  %v910_v13 = vld [vmem:[%s1130_s2 + $0x20] sm:$0xff]  ;;  %v909_v17 = vld [vmem:[%s1130_s2 + $0x18] sm:$0xff]  ;;  %v517_v21 = vld [vmem:[%s1052_s7 + $0x8] sm:$0x3]  ;;  %v443_v28 = vunpack.c.l.b16 %v420_v20 }
  0x11   : > { %405 = vmatpush.bf16.msra.mxu1 %v912_v5  ;;  %v928_v14 = vld [vmem:[%s1130_s2 + $0xa0] sm:$0xff]  ;;  %v927_v18 = vld [vmem:[%s1130_s2 + $0x98] sm:$0xff]  ;;  %v917_v22 = vld [vmem:[%s1130_s2 + $0x50] sm:$0xff]  ;;  %v540_v29 = vunpack.c.l.b16 %v517_v21 }
  0x12   : > { %500 = vmatpush.bf16.msra.mxu2 %v930_v6  ;;  %v937_v15 = vld [vmem:[%s1130_s2 + $0xe0] sm:$0xff]  ;;  %v936_v19 = vld [vmem:[%s1130_s2 + $0xd8] sm:$0xff]  ;;  %v908_v23 = vld [vmem:[%s1130_s2 + $0x10] sm:$0xff]  ;;  %v445_v37 = vpack.c.b16 %v443_v28, %v443_v28 }
  0x13   : > { %596 = vmatpush.bf16.msra.mxu3 %v939_v7  ;;  %v926_v24 = vld [vmem:[%s1130_s2 + $0x90] sm:$0xff]  ;;  %v816_v26 = vld [vmem:[%s1057_s10] sm:$0xc]  ;;  %v923_v27 = vld [vmem:[%s1057_s10] sm:$0xf0]  ;;  %v542_v39 = vpack.c.b16 %v540_v29, %v540_v29 }
  0x14   : > { %338 = vmatpush.bf16.msra.mxu0 %v920_v8  ;;  %v935_v25 = vld [vmem:[%s1130_s2 + $0xd0] sm:$0xff]  ;;  %v868_v30 = vld [vmem:[%s1052_s7] sm:$0xc]  ;;  %v932_v31 = vld [vmem:[%s1052_s7] sm:$0xf0]  ;;  %v817_v34 = vor.u32 %v923_v27, %v816_v26  ;;  %v448_v45 = vrot.slane %v445_v37, 2 }
  0x15   : > { %406 = vmatpush.bf16.msra.mxu1 %v911_v9  ;;  %v916_v32 = vld [vmem:[%s1130_s2 + $0x48] sm:$0xff]  ;;  %v869_v38 = vor.u32 %v932_v31, %v868_v30  ;;  %v915_v40 = vld [vmem:[%s1130_s2 + $0x40] sm:$0xff]  ;;  %v544_v47 = vrot.slane %v542_v39, 2 }
  0x16   : > { %501 = vmatpush.bf16.msra.mxu2 %v929_v10  ;;  %v907_v33 = vld [vmem:[%s1130_s2 + $0x8] sm:$0xff]  ;;  %v906_v41 = vld [vmem:[%s1130_s2] sm:$0xff]  ;;  %v447_v44 = vrot.slane %v817_v34, 2 }
  0x17   : > { %597 = vmatpush.bf16.msra.mxu3 %v938_v11  ;;  %v925_v35 = vld [vmem:[%s1130_s2 + $0x88] sm:$0xff]  ;;  %v924_v42 = vld [vmem:[%s1130_s2 + $0x80] sm:$0xff]  ;;  %v543_v46 = vrot.slane %v869_v38, 2 }
  0x18   : > { %339 = vmatpush.bf16.msra.mxu0 %v919_v12  ;;  %v934_v36 = vld [vmem:[%s1130_s2 + $0xc8] sm:$0xff]  ;;  %v933_v43 = vld [vmem:[%s1130_s2 + $0xc0] sm:$0xff]  ;;  %v449_v50 = vsel %vm446_vm0, %v447_v44, %v448_v45 }
  0x19   : > { %407 = vmatpush.bf16.msra.mxu1 %v910_v13  ;;  %v914_v48 = vld [vmem:[%s1052_s7] sm:$0xff]  ;;  %v545_v51 = vsel %vm446_vm0, %v543_v46, %v544_v47 }
  0x1a   : > { %502 = vmatpush.bf16.msra.mxu2 %v928_v14  ;;  %v905_v49 = vld [vmem:[%s1057_s10] sm:$0xff] }
  0x1b   : > { %598 = vmatpush.bf16.msra.mxu3 %v937_v15  ;;  %v950_v58 = vld [vmem:[%s1131_s3] ss:$0 sm:$0xff] }
  0x1c   : > { %340 = vmatpush.bf16.msra.mxu0 %v918_v16  ;;  %v951_v63 = vld [vmem:[%s1132_s4] ss:$0 sm:$0xff] }
  0x1d   : > { %408 = vmatpush.bf16.msra.mxu1 %v909_v17 }
  0x1e   : > { %503 = vmatpush.bf16.msra.mxu2 %v927_v18 }
  0x1f   : > { %599 = vmatpush.bf16.msra.mxu3 %v936_v19 }
  0x20   : > { %341 = vmatpush.bf16.msra.mxu0 %v917_v22 }
  0x21   : > { %409 = vmatpush.bf16.msra.mxu1 %v908_v23 }
  0x22   : > { %504 = vmatpush.bf16.msra.mxu2 %v926_v24 }
  0x23   : > { %600 = vmatpush.bf16.msra.mxu3 %v935_v25 }
  0x24   : > { %342 = vmatpush.bf16.msra.mxu0 %v916_v32 }
  0x25   : > { %410 = vmatpush.bf16.msra.mxu1 %v907_v33 }
  0x26   : > { %505 = vmatpush.bf16.msra.mxu2 %v925_v35 }
  0x27   : > { %601 = vmatpush.bf16.msra.mxu3 %v934_v36 }
  0x28   : > { %343 = vmatpush.bf16.msra.mxu0 %v915_v40 }
  0x29   : > { %411 = vmatpush.bf16.msra.mxu1 %v906_v41 }
  0x2a   : > { %506 = vmatpush.bf16.msra.mxu2 %v924_v42 }
  0x2b   : > { %602 = vmatpush.bf16.msra.mxu3 %v933_v43  ;;  %344 = vmatmul.bf16.vlgmr.msra.gmra.mxu0 %v914_v48 }
  0x2c   : > { %412 = vmatmul.bf16.vlgmr.msra.gmra.mxu1 %v905_v49 }
  0x2d   : > { %507 = vmatmul.bf16.vlgmr.msra.gmra.mxu2 %v449_v50 }
  0x2e   : > { %603 = vmatmul.bf16.vlgmr.msra.gmra.mxu3 %v545_v51 }
  0xa8   : > { %v345_v52 = vpop.f32.mrf.mxu0 }
  0xa9   : > { %v413_v53 = vpop.f32.mrf.mxu1 }
  0xaa   : > { %v414_v54 = vadd.f32 %v413_v53, %v345_v52 }
  0xb0   : > { %v508_v55 = vpop.f32.mrf.mxu2  ;;  %v347_v60 = vpop.f32.mrf.mxu0 }
  0xb1   : > { %v604_v56 = vpop.f32.mrf.mxu3  ;;  %v513_v57 = vadd.f32 %v508_v55, %v414_v54  ;;  %v415_v61 = vpop.f32.mrf.mxu1 }
  0xb2   : > { %v416_v1 = vadd.f32 %v415_v61, %v347_v60 }
  0xb3   : > { %v609_v59 = vadd.f32 %v604_v56, %v513_v57 }
  0xb5   : > { %v615_v62 = vadd.f32 %v950_v58, %v609_v59 }
  0xb7   : > { %vm617_vm1 = vcmp.gt.f32.partialorder %v615_v62, 0.0  ;;  %v619_v0 = vmul.f32 0.2, %v615_v62 }
  0xb8   : > { %v510_v2 = vpop.f32.mrf.mxu2 }
  0xb9   : > { %v621_v3 = vsel %vm617_vm1, %v615_v62, %v619_v0  ;;  %v514_v4 = vadd.f32 %v510_v2, %v416_v1  ;;  %v606_v6 = vpop.f32.mrf.mxu3 }
  0xba   : > { %v627_v5 = vadd.f32 %v951_v63, %v621_v3 }
  0xbb   : > { %v610_v7 = vadd.f32 %v606_v6, %v514_v4 }
  0xbc   : > { %v629_v8 = vpack.c.bf16 %v627_v5, %v627_v5 }
  0xbd   : > { %v616_v9 = vadd.f32 %v950_v58, %v610_v7 }
  0xbe   : > { %632 = vst.msk [vmem:[%s244_s29] sm:$0xf] %vm631_vm2, %v629_v8 }
  0xbf   : > { %vm618_vm3 = vcmp.gt.f32.partialorder %v616_v9, 0.0  ;;  %v620_v10 = vmul.f32 0.2, %v616_v9 }
  0xc1   : > { %v622_v11 = vsel %vm618_vm3, %v616_v9, %v620_v10 }
  0xc2   : > { %v628_v12 = vadd.f32 %v951_v63, %v622_v11 }
  0xc4   : > { %v630_v13 = vpack.c.bf16 %v628_v12, %v628_v12 }
  0xc6   : > { %633 = vst.msk [vmem:[%s244_s29 + $0x4] sm:$0xf] %vm631_vm2, %v630_v13 }
  0xc7 PF: > { %s15_s18 = sadd.s32 1, %s958_s18  }
  0xc8   : > { %p12_p4 = scmp.ge.s32.totalorder %s15_s18, 5  }
  0xca   :  { %14 = sbr.rel (!%p12_p4) target bundleno = 1 (0x1), region = 76 }

// kernel: discriminator_forward.9
= control target key start
LH: loop header
LB: loop body
LE: loop exit
PB: predicated region body
PF: predicated region fallthrough
CT: control target
= control target key end

     0   :  { %v337_v38 = vlaneseq  ;;  %vm343_vm3 = vcmask 1042432   ;;  %s678_s1 = inlined_call_operand.vmem [shape: bf16[512,128], index: 1, kind: input, shape index: {}]   ;;  %s679_s0 = inlined_call_operand.vmem [shape: bf16[3,512], index: 0, kind: input, shape index: {}]   ;;  %s680_s2 = inlined_call_operand.vmem [shape: f32[1,128], index: 2, kind: input, shape index: {}]   ;;  %s681_s3 = inlined_call_operand.vmem [shape: f32[3,128], index: 3, kind: output, shape index: {}]  }
   0x1   :  { %v511_v0 = vld [vmem:[%s678_s1 + $0x38] sm:$0xff]  ;;  %v510_v4 = vld [vmem:[%s678_s1 + $0x30] sm:$0xff]  ;;  %v509_v8 = vld [vmem:[%s678_s1 + $0x28] sm:$0xff] }
   0x2   :  { %v519_v1 = vld [vmem:[%s678_s1 + $0x78] sm:$0xff]  ;;  %285 = vmatpush.bf16.msra.mxu0 %v511_v0  ;;  %v518_v5 = vld [vmem:[%s678_s1 + $0x70] sm:$0xff]  ;;  %v517_v9 = vld [vmem:[%s678_s1 + $0x68] sm:$0xff]  ;;  %v338_v42 = vand.u32 127, %v337_v38 }
   0x3   :  { %v527_v2 = vld [vmem:[%s678_s1 + $0xb8] sm:$0xff]  ;;  %298 = vmatpush.bf16.msra.mxu1 %v519_v1  ;;  %v526_v6 = vld [vmem:[%s678_s1 + $0xb0] sm:$0xff]  ;;  %v525_v10 = vld [vmem:[%s678_s1 + $0xa8] sm:$0xff] }
   0x4   :  { %v535_v3 = vld [vmem:[%s678_s1 + $0xf8] sm:$0xff]  ;;  %311 = vmatpush.bf16.msra.mxu2 %v527_v2  ;;  %v534_v7 = vld [vmem:[%s678_s1 + $0xf0] sm:$0xff]  ;;  %v533_v11 = vld [vmem:[%s678_s1 + $0xe8] sm:$0xff]  ;;  %vm339_vm0 = vcmp.ge.s32.totalorder %v338_v42, 1  ;;  %vm340_vm1 = vcmp.lt.s32.totalorder %v338_v42, 11 }
   0x5   :  { %324 = vmatpush.bf16.msra.mxu3 %v535_v3  ;;  %v508_v12 = vld [vmem:[%s678_s1 + $0x20] sm:$0xff]  ;;  %v507_v17 = vld [vmem:[%s678_s1 + $0x18] sm:$0xff]  ;;  %v506_v21 = vld [vmem:[%s678_s1 + $0x10] sm:$0xff] }
   0x6   :  { %286 = vmatpush.bf16.msra.mxu0 %v510_v4  ;;  %v516_v13 = vld [vmem:[%s678_s1 + $0x60] sm:$0xff]  ;;  %v515_v18 = vld [vmem:[%s678_s1 + $0x58] sm:$0xff]  ;;  %v514_v22 = vld [vmem:[%s678_s1 + $0x50] sm:$0xff] }
   0x7   :  { %299 = vmatpush.bf16.msra.mxu1 %v518_v5  ;;  %v14_v14 = vld [vmem:[%s679_s0] sm:$0xff]  ;;  %v523_v19 = vld [vmem:[%s678_s1 + $0x98] sm:$0xff]  ;;  %v522_v23 = vld [vmem:[%s678_s1 + $0x90] sm:$0xff] }
   0x8   :  { %312 = vmatpush.bf16.msra.mxu2 %v526_v6  ;;  %v524_v15 = vld [vmem:[%s678_s1 + $0xa0] sm:$0xff]  ;;  %84 = vst [vmem:[#allocation1] ss:$4 sm:$0xff] %v14_v14  ;;  %v531_v20 = vld [vmem:[%s678_s1 + $0xd8] sm:$0xff]  ;;  %v530_v24 = vld [vmem:[%s678_s1 + $0xd0] sm:$0xff] }
   0x9   :  { %325 = vmatpush.bf16.msra.mxu3 %v534_v7  ;;  %v532_v16 = vld [vmem:[%s678_s1 + $0xe0] sm:$0xff]  ;;  %v505_v25 = vld [vmem:[%s678_s1 + $0x8] sm:$0xff]  ;;  %vm663_vm2 = vmand %vm339_vm0, %vm340_vm1 }
   0xa   :  { %287 = vmatpush.bf16.msra.mxu0 %v509_v8  ;;  %v513_v26 = vld [vmem:[%s678_s1 + $0x48] sm:$0xff]  ;;  %v504_v29 = vld [vmem:[%s678_s1] sm:$0xff] }
   0xb   :  { %300 = vmatpush.bf16.msra.mxu1 %v517_v9  ;;  %v521_v27 = vld [vmem:[%s678_s1 + $0x88] sm:$0xff]  ;;  %v512_v30 = vld [vmem:[%s678_s1 + $0x40] sm:$0xff] }
   0xc   :  { %313 = vmatpush.bf16.msra.mxu2 %v525_v10  ;;  %v529_v28 = vld [vmem:[%s678_s1 + $0xc8] sm:$0xff]  ;;  %v520_v31 = vld [vmem:[%s678_s1 + $0x80] sm:$0xff] }
   0xd   :  { %326 = vmatpush.bf16.msra.mxu3 %v533_v11  ;;  %v528_v32 = vld [vmem:[%s678_s1 + $0xc0] sm:$0xff] }
   0xe   :  { %288 = vmatpush.bf16.msra.mxu0 %v508_v12  ;;  %v536_v37 = vld [vmem:[%s680_s2] ss:$0 sm:$0xff] }
   0xf   :  { %301 = vmatpush.bf16.msra.mxu1 %v516_v13  ;;  %v85_v33 = vld.sshfl [vmem:[#allocation1] sm:$0xff pattern:$0x73625140]  ;;  %v86_v34 = vld.sshfl [vmem:[#allocation1 + $0x8] sm:$0xff pattern:$0x73625140] }
  0x10   :  { %314 = vmatpush.bf16.msra.mxu2 %v524_v15  ;;  %v87_v35 = vld.sshfl [vmem:[#allocation1 + $0x10] sm:$0xff pattern:$0x73625140]  ;;  %v88_v36 = vld.sshfl [vmem:[#allocation1 + $0x18] sm:$0xff pattern:$0x73625140] }
  0x11   :  { %327 = vmatpush.bf16.msra.mxu3 %v532_v16 }
  0x12   :  { %289 = vmatpush.bf16.msra.mxu0 %v507_v17 }
  0x13   :  { %302 = vmatpush.bf16.msra.mxu1 %v515_v18 }
  0x14   :  { %315 = vmatpush.bf16.msra.mxu2 %v523_v19 }
  0x15   :  { %328 = vmatpush.bf16.msra.mxu3 %v531_v20 }
  0x16   :  { %290 = vmatpush.bf16.msra.mxu0 %v506_v21 }
  0x17   :  { %303 = vmatpush.bf16.msra.mxu1 %v514_v22 }
  0x18   :  { %316 = vmatpush.bf16.msra.mxu2 %v522_v23 }
  0x19   :  { %329 = vmatpush.bf16.msra.mxu3 %v530_v24 }
  0x1a   :  { %291 = vmatpush.bf16.msra.mxu0 %v505_v25 }
  0x1b   :  { %304 = vmatpush.bf16.msra.mxu1 %v513_v26 }
  0x1c   :  { %317 = vmatpush.bf16.msra.mxu2 %v521_v27 }
  0x1d   :  { %330 = vmatpush.bf16.msra.mxu3 %v529_v28 }
  0x1e   :  { %292 = vmatpush.bf16.msra.mxu0 %v504_v29 }
  0x1f   :  { %305 = vmatpush.bf16.msra.mxu1 %v512_v30 }
  0x20   :  { %318 = vmatpush.bf16.msra.mxu2 %v520_v31 }
  0x21   :  { %331 = vmatpush.bf16.msra.mxu3 %v528_v32  ;;  %293 = vmatmul.bf16.vlgmr.msra.gmra.mxu0 %v85_v33 }
  0x22   :  { %306 = vmatmul.bf16.vlgmr.msra.gmra.mxu1 %v86_v34 }
  0x23   :  { %319 = vmatmul.bf16.vlgmr.msra.gmra.mxu2 %v87_v35 }
  0x24   :  { %332 = vmatmul.bf16.vlgmr.msra.gmra.mxu3 %v88_v36 }
  0x9e   :  { %v294_v39 = vpop.f32.mrf.mxu0 }
  0x9f   :  { %v307_v40 = vpop.f32.mrf.mxu1  ;;  %v295_v41 = vadd.f32 %v536_v37, %v294_v39 }
  0xa1   :  { %v308_v43 = vadd.f32 %v307_v40, %v295_v41 }
  0xa6   :  { %v320_v44 = vpop.f32.mrf.mxu2  ;;  %v296_v47 = vpop.f32.mrf.mxu0 }
  0xa7   :  { %v333_v45 = vpop.f32.mrf.mxu3  ;;  %v321_v46 = vadd.f32 %v320_v44, %v308_v43  ;;  %v309_v48 = vpop.f32.mrf.mxu1 }
  0xa9   :  { %v334_v50 = vadd.f32 %v333_v45, %v321_v46 }
  0xab   :  { %v342_v51 = vsel %vm663_vm2, %v334_v50, -1e+30 }
  0xac   :  { %v344_v52 = vsel %vm343_vm3, %v342_v51, -inf }
  0xad   :  { %345 = vmax.xlane.f32.xlu0 %v344_v52 }
  0xae   :  { %v322_v53 = vpop.f32.mrf.mxu2 }
  0xaf   :  { %v335_v54 = vpop.f32.mrf.mxu3 }
 0x120   :  { %v346_v55 = vpop.xlane.xlu0 %345 }
 0x121   :  { %v347_v56 = vsel %vm663_vm2, %v334_v50, %v346_v55 }
 0x122   :  { %v348_v57 = vsub.f32 %v347_v56, %v346_v55 }
 0x124   :  { %v349_v58 = vmul.f32 1.442695, %v348_v57 }
 0x126   :  { %537 = vpow2.f32 %v349_v58 }
 0x12c   :  { %v538_v59 = vpop.eup %537 }
 0x12d   :  { %v351_v60 = vsel %vm663_vm2, %v538_v59, 0.0 }
 0x12e   :  { %v352_v61 = vsel %vm343_vm3, %v351_v60, 0.0 }
 0x12f   :  { %353 = vadd.xlane.f32.xlu0 %v352_v61 }
 0x1a2   :  { %v354_v62 = vpop.xlane.xlu0 %353 }
 0x1a3   :  { %539 = vrcp.f32 %v354_v62  ;;  %v366_v2 = vand.u32 2147483648, %v354_v62  ;;  %v364_v4 = vand.u32 2147483647, %v354_v62  ;;  %vm360_vm5 = vweird.f32 %v354_v62 }
 0x1a5   :  { %v367_v6 = vor.u32 1.1754944e-38, %v366_v2  ;;  %vm365_vm7 = vcmp.eq.f32.partialorder %v364_v4, 8.507059e+37 }
 0x1a9   :  { %v540_v63 = vpop.eup %539 }
 0x1aa   :  { %v356_v0 = vmul.f32 %v540_v63, %v354_v62  ;;  %vm361_vm4 = vweird.f32 %v540_v63 }
 0x1ab   :  { %vm362_vm6 = vmor %vm360_vm5, %vm361_vm4 }
 0x1ac   :  { %v357_v1 = vsub.f32 1.0, %v356_v0 }
 0x1ae   :  { %v358_v3 = vmul.f32 %v540_v63, %v357_v1 }
 0x1b0   :  { %v359_v5 = vadd.f32 %v540_v63, %v358_v3 }
 0x1b2   :  { %v363_v7 = vsel %vm362_vm6, %v540_v63, %v359_v5 }
 0x1b3   :  { %v368_v8 = vsel %vm365_vm7, %v367_v6, %v363_v7 }
 0x1b4   :  { %v369_v9 = vmul.f32 %v368_v8, %v351_v60 }
 0x1b6   :  { %v370_v10 = vsel %vm663_vm2, %v369_v9, %v334_v50 }
 0x1b7   :  { %371 = vst [vmem:[%s681_s3] sm:$0x7] %v370_v10 }

// kernel: discriminator_forward.8
= control target key start
LH: loop header
LB: loop body
LE: loop exit
PB: predicated region body
PF: predicated region fallthrough
CT: control target
= control target key end

     0   :  { %s1458_s18 = smov 0   ;;  %s1692_s0 = inlined_call_operand.vmem [shape: bf16[3,6,256], index: 0, kind: input, shape index: {}]   ;;  %s1693_s1 = inlined_call_operand.vmem [shape: bf16[3,6,256], index: 1, kind: input, shape index: {}]   ;;  %s1694_s2 = inlined_call_operand.vmem [shape: bf16[4,256,128], index: 2, kind: input, shape index: {}]   ;;  %s1695_s3 = inlined_call_operand.vmem [shape: f32[1,128], index: 3, kind: input, shape index: {}]   ;;  %s1696_s4 = inlined_call_operand.vmem [shape: f32[1,128], index: 4, kind: input, shape index: {}]   ;;  %s1697_s5 = inlined_call_operand.vmem [shape: bf16[3,4,128], index: 5, kind: output, shape index: {}]  }
   0x1 LB: > { %s980_s19 = sadd.s32 4294967295, %s1426_s18   ;;  %p984_p0 = scmp.ge.s32.totalorder %s1426_s18, 1  ;;  %s1426_s18 = sphi %s1458_s18, %s15_s18  }
   0x2   : > { %p197_p1 = scmp.lt.s32.totalorder %s1426_s18, 4 }
   0x4   : > { %p198_p2 = pnand %p984_p0, %p197_p1 }
   0x5   : > { %p229_p3 = scmp.lt.s32.totalorder (!%p198_p2), %s980_s19, 2 }
   0x6   : > { %201 = sbr.rel (%p198_p2) target bundleno = 224 (0xe0), region = 40 }
   0xb   : > { %v1369_v0 = vld [vmem:[%s1694_s2 + $0xb8] sm:$0xff]  ;;  %v1368_v4 = vld [vmem:[%s1694_s2 + $0xb0] sm:$0xff]  ;;  %v1367_v8 = vld [vmem:[%s1694_s2 + $0xa8] sm:$0xff]  ;;  %s1699_s19 = smov (!%p229_p3, %s980_s19), 2 }
   0xc   : > { %v1377_v1 = vld [vmem:[%s1694_s2 + $0xf8] sm:$0xff]  ;;  %413 = vmatpush.bf16.msra.mxu0 %v1369_v0  ;;  %v1376_v5 = vld [vmem:[%s1694_s2 + $0xf0] sm:$0xff]  ;;  %v1375_v9 = vld [vmem:[%s1694_s2 + $0xe8] sm:$0xff]  ;;  %s1344_s12 = sshll.u32 %s1699_s19, 3  ;;  %s989_s26 = sshll.u32 %s1699_s19, 1 }
   0xd   : > { %v1353_v2 = vld [vmem:[%s1694_s2 + $0x38] sm:$0xff]  ;;  %426 = vmatpush.bf16.msra.mxu1 %v1377_v1  ;;  %v1352_v6 = vld [vmem:[%s1694_s2 + $0x30] sm:$0xff]  ;;  %v1351_v10 = vld [vmem:[%s1694_s2 + $0x28] sm:$0xff]  ;;  %s1548_s25 = scalar_lea.vmem %s1692_s0, %s1344_s12  ;;  %s1553_s28 = scalar_lea.vmem %s1693_s1, %s1344_s12 }
   0xe   : > { %v1361_v3 = vld [vmem:[%s1694_s2 + $0x78] sm:$0xff]  ;;  %542 = vmatpush.bf16.msra.mxu2 %v1353_v2  ;;  %v1360_v7 = vld [vmem:[%s1694_s2 + $0x70] sm:$0xff]  ;;  %v1359_v11 = vld [vmem:[%s1694_s2 + $0x68] sm:$0xff] }
   0xf   : > { %555 = vmatpush.bf16.msra.mxu3 %v1361_v3  ;;  %v1366_v12 = vld [vmem:[%s1694_s2 + $0xa0] sm:$0xff]  ;;  %v1365_v16 = vld [vmem:[%s1694_s2 + $0x98] sm:$0xff]  ;;  %v1364_v20 = vld [vmem:[%s1694_s2 + $0x90] sm:$0xff] }
  0x10   : > { %414 = vmatpush.bf16.msra.mxu0 %v1368_v4  ;;  %v1374_v13 = vld [vmem:[%s1694_s2 + $0xe0] sm:$0xff]  ;;  %v1373_v17 = vld [vmem:[%s1694_s2 + $0xd8] sm:$0xff]  ;;  %v1372_v21 = vld [vmem:[%s1694_s2 + $0xd0] sm:$0xff] }
  0x11   : > { %427 = vmatpush.bf16.msra.mxu1 %v1376_v5  ;;  %v1350_v14 = vld [vmem:[%s1694_s2 + $0x20] sm:$0xff]  ;;  %v1349_v18 = vld [vmem:[%s1694_s2 + $0x18] sm:$0xff]  ;;  %v1348_v22 = vld [vmem:[%s1694_s2 + $0x10] sm:$0xff] }
  0x12   : > { %543 = vmatpush.bf16.msra.mxu2 %v1352_v6  ;;  %v1358_v15 = vld [vmem:[%s1694_s2 + $0x60] sm:$0xff]  ;;  %v1357_v19 = vld [vmem:[%s1694_s2 + $0x58] sm:$0xff]  ;;  %v1356_v23 = vld [vmem:[%s1694_s2 + $0x50] sm:$0xff] }
  0x13   : > { %556 = vmatpush.bf16.msra.mxu3 %v1360_v7  ;;  %v1363_v24 = vld [vmem:[%s1694_s2 + $0x88] sm:$0xff]  ;;  %v243_v28 = vld [vmem:[%s1548_s25] sm:$0x33]  ;;  %v1385_v38 = vld [vmem:[%s1694_s2 + $0x138] sm:$0xff] }
  0x14   : > { %415 = vmatpush.bf16.msra.mxu0 %v1367_v8  ;;  %v1371_v25 = vld [vmem:[%s1694_s2 + $0xc8] sm:$0xff]  ;;  %v276_v29 = vld [vmem:[%s1553_s28] sm:$0x33]  ;;  %v440_v32 = vunpack.c.l.b16 %v243_v28  ;;  %v441_v33 = vunpack.c.h.b16 %v243_v28  ;;  %v1393_v39 = vld [vmem:[%s1694_s2 + $0x178] sm:$0xff] }
  0x15   : > { %428 = vmatpush.bf16.msra.mxu1 %v1375_v9  ;;  %v1347_v26 = vld [vmem:[%s1694_s2 + $0x8] sm:$0xff]  ;;  %v1362_v30 = vld [vmem:[%s1694_s2 + $0x80] sm:$0xff]  ;;  %v311_v36 = vunpack.c.l.b16 %v276_v29  ;;  %v312_v37 = vunpack.c.h.b16 %v276_v29  ;;  %v1401_v40 = vld [vmem:[%s1694_s2 + $0x1b8] sm:$0xff] }
  0x16   : > { %544 = vmatpush.bf16.msra.mxu2 %v1351_v10  ;;  %v1355_v27 = vld [vmem:[%s1694_s2 + $0x48] sm:$0xff]  ;;  %v1370_v31 = vld [vmem:[%s1694_s2 + $0xc0] sm:$0xff]  ;;  %v1409_v41 = vld [vmem:[%s1694_s2 + $0x1f8] sm:$0xff]  ;;  %v442_v42 = vpack.c.b16 %v440_v32, %v440_v32  ;;  %v443_v43 = vpack.c.b16 %v441_v33, %v441_v33 }
  0x17   : > { %557 = vmatpush.bf16.msra.mxu3 %v1359_v11  ;;  %v1346_v34 = vld [vmem:[%s1694_s2] sm:$0xff]  ;;  %v313_v44 = vpack.c.b16 %v311_v36, %v311_v36  ;;  %v314_v45 = vpack.c.b16 %v312_v37, %v312_v37  ;;  %v1384_v46 = vld [vmem:[%s1694_s2 + $0x130] sm:$0xff]  ;;  %v1383_v50 = vld [vmem:[%s1694_s2 + $0x128] sm:$0xff] }
  0x18   : > { %416 = vmatpush.bf16.msra.mxu0 %v1366_v12  ;;  %v1354_v35 = vld [vmem:[%s1694_s2 + $0x40] sm:$0xff]  ;;  %v1392_v47 = vld [vmem:[%s1694_s2 + $0x170] sm:$0xff]  ;;  %v1391_v51 = vld [vmem:[%s1694_s2 + $0x168] sm:$0xff] }
  0x19   : > { %429 = vmatpush.bf16.msra.mxu1 %v1374_v13  ;;  %v1400_v48 = vld [vmem:[%s1694_s2 + $0x1b0] sm:$0xff]  ;;  %v1399_v52 = vld [vmem:[%s1694_s2 + $0x1a8] sm:$0xff]  ;;  %v1382_v54 = vld [vmem:[%s1694_s2 + $0x120] sm:$0xff] }
  0x1a   : > { %545 = vmatpush.bf16.msra.mxu2 %v1350_v14  ;;  %v1408_v49 = vld [vmem:[%s1694_s2 + $0x1f0] sm:$0xff]  ;;  %v1407_v53 = vld [vmem:[%s1694_s2 + $0x1e8] sm:$0xff]  ;;  %v1390_v55 = vld [vmem:[%s1694_s2 + $0x160] sm:$0xff] }
  0x1b   : > { %558 = vmatpush.bf16.msra.mxu3 %v1358_v15  ;;  %v1398_v56 = vld [vmem:[%s1694_s2 + $0x1a0] sm:$0xff]  ;;  %v1381_v58 = vld [vmem:[%s1694_s2 + $0x118] sm:$0xff]  ;;  %v1380_v63 = vld [vmem:[%s1694_s2 + $0x110] sm:$0xff] }
  0x1c   : > { %417 = vmatpush.bf16.msra.mxu0 %v1365_v16  ;;  %v1406_v57 = vld [vmem:[%s1694_s2 + $0x1e0] sm:$0xff]  ;;  %v1389_v59 = vld [vmem:[%s1694_s2 + $0x158] sm:$0xff]  ;;  %v1388_v0 = vld [vmem:[%s1694_s2 + $0x150] sm:$0xff] }
  0x1d   : > { %430 = vmatpush.bf16.msra.mxu1 %v1373_v17  ;;  %v1397_v60 = vld [vmem:[%s1694_s2 + $0x198] sm:$0xff]  ;;  %v568_v62 = vld [vmem:[%s1548_s25] sm:$0x66]  ;;  %v1396_v2 = vld [vmem:[%s1694_s2 + $0x190] sm:$0xff]  ;;  %s242_s25 = scalar_lea.vmem %s1697_s5, %s989_s26 }
  0x1e   : > { %546 = vmatpush.bf16.msra.mxu2 %v1349_v18  ;;  %v1405_v61 = vld [vmem:[%s1694_s2 + $0x1d8] sm:$0xff]  ;;  %v734_v1 = vld [vmem:[%s1553_s28] sm:$0x66]  ;;  %v1404_v3 = vld [vmem:[%s1694_s2 + $0x1d0] sm:$0xff]  ;;  %v603_v4 = vunpack.c.l.b16 %v568_v62  ;;  %v604_v5 = vunpack.c.h.b16 %v568_v62 }
  0x1f   : > { %559 = vmatpush.bf16.msra.mxu3 %v1357_v19  ;;  %v1379_v6 = vld [vmem:[%s1694_s2 + $0x108] sm:$0xff]  ;;  %v769_v8 = vunpack.c.l.b16 %v734_v1  ;;  %v770_v9 = vunpack.c.h.b16 %v734_v1  ;;  %v1378_v14 = vld [vmem:[%s1694_s2 + $0x100] sm:$0xff] }
  0x20   : > { %418 = vmatpush.bf16.msra.mxu0 %v1364_v20  ;;  %v1387_v7 = vld [vmem:[%s1694_s2 + $0x148] sm:$0xff]  ;;  %v605_v12 = vpack.c.b16 %v603_v4, %v603_v4  ;;  %v606_v13 = vpack.c.b16 %v604_v5, %v604_v5  ;;  %v1386_v15 = vld [vmem:[%s1694_s2 + $0x140] sm:$0xff] }
  0x21   : > { %431 = vmatpush.bf16.msra.mxu1 %v1372_v21  ;;  %v1395_v10 = vld [vmem:[%s1694_s2 + $0x188] sm:$0xff]  ;;  %v771_v16 = vpack.c.b16 %v769_v8, %v769_v8  ;;  %v772_v17 = vpack.c.b16 %v770_v9, %v770_v9  ;;  %v1394_v18 = vld [vmem:[%s1694_s2 + $0x180] sm:$0xff] }
  0x22   : > { %547 = vmatpush.bf16.msra.mxu2 %v1348_v22  ;;  %v1403_v11 = vld [vmem:[%s1694_s2 + $0x1c8] sm:$0xff]  ;;  %v1402_v19 = vld [vmem:[%s1694_s2 + $0x1c0] sm:$0xff]  ;;  %v607_v20 = vrot.slane %v605_v12, 1  ;;  %v608_v21 = vrot.slane %v606_v13, 1 }
  0x23   : > { %560 = vmatpush.bf16.msra.mxu3 %v1356_v23  ;;  %v773_v22 = vrot.slane %v771_v16, 1  ;;  %v774_v23 = vrot.slane %v772_v17, 1 }
  0x24   : > { %419 = vmatpush.bf16.msra.mxu0 %v1363_v24 }
  0x25   : > { %432 = vmatpush.bf16.msra.mxu1 %v1371_v25 }
  0x26   : > { %548 = vmatpush.bf16.msra.mxu2 %v1347_v26 }
  0x27   : > { %561 = vmatpush.bf16.msra.mxu3 %v1355_v27 }
  0x28   : > { %420 = vmatpush.bf16.msra.mxu0 %v1362_v30 }
  0x29   : > { %433 = vmatpush.bf16.msra.mxu1 %v1370_v31 }
  0x2a   : > { %549 = vmatpush.bf16.msra.mxu2 %v1346_v34 }
  0x2b   : > { %562 = vmatpush.bf16.msra.mxu3 %v1354_v35  ;;  %421 = vmatmul.bf16.vlgmr.msra.gmra.mxu0 %v313_v44 }
  0x2c   : > { %707 = vmatpush.bf16.msrb.mxu0 %v1385_v38  ;;  %434 = vmatmul.bf16.vlgmr.msra.gmra.mxu1 %v314_v45 }
  0x2d   : > { %720 = vmatpush.bf16.msrb.mxu1 %v1393_v39  ;;  %550 = vmatmul.bf16.vlgmr.msra.gmra.mxu2 %v442_v42  ;;  %v1418_v42 = vld [vmem:[%s1695_s3] ss:$0 sm:$0xff] }
  0x2e   : > { %873 = vmatpush.bf16.msrb.mxu2 %v1401_v40  ;;  %563 = vmatmul.bf16.vlgmr.msra.gmra.mxu3 %v443_v43 }
  0x2f   : > { %886 = vmatpush.bf16.msrb.mxu3 %v1409_v41 }
  0x30   : > { %708 = vmatpush.bf16.msrb.mxu0 %v1384_v46 }
  0x31   : > { %721 = vmatpush.bf16.msrb.mxu1 %v1392_v47  ;;  %v1419_v47 = vld [vmem:[%s1696_s4] ss:$0 sm:$0xff] }
  0x32   : > { %874 = vmatpush.bf16.msrb.mxu2 %v1400_v48 }
  0x33   : > { %887 = vmatpush.bf16.msrb.mxu3 %v1408_v49 }
  0x34   : > { %709 = vmatpush.bf16.msrb.mxu0 %v1383_v50 }
  0x35   : > { %722 = vmatpush.bf16.msrb.mxu1 %v1391_v51 }
  0x36   : > { %875 = vmatpush.bf16.msrb.mxu2 %v1399_v52 }
  0x37   : > { %888 = vmatpush.bf16.msrb.mxu3 %v1407_v53 }
  0x38   : > { %710 = vmatpush.bf16.msrb.mxu0 %v1382_v54 }
  0x39   : > { %723 = vmatpush.bf16.msrb.mxu1 %v1390_v55 }
  0x3a   : > { %876 = vmatpush.bf16.msrb.mxu2 %v1398_v56 }
  0x3b   : > { %889 = vmatpush.bf16.msrb.mxu3 %v1406_v57 }
  0x3c   : > { %711 = vmatpush.bf16.msrb.mxu0 %v1381_v58 }
  0x3d   : > { %724 = vmatpush.bf16.msrb.mxu1 %v1389_v59 }
  0x3e   : > { %877 = vmatpush.bf16.msrb.mxu2 %v1397_v60 }
  0x3f   : > { %890 = vmatpush.bf16.msrb.mxu3 %v1405_v61 }
  0x40   : > { %712 = vmatpush.bf16.msrb.mxu0 %v1380_v63 }
  0x41   : > { %725 = vmatpush.bf16.msrb.mxu1 %v1388_v0 }
  0x42   : > { %878 = vmatpush.bf16.msrb.mxu2 %v1396_v2 }
  0x43   : > { %891 = vmatpush.bf16.msrb.mxu3 %v1404_v3 }
  0x44   : > { %713 = vmatpush.bf16.msrb.mxu0 %v1379_v6 }
  0x45   : > { %726 = vmatpush.bf16.msrb.mxu1 %v1387_v7 }
  0x46   : > { %879 = vmatpush.bf16.msrb.mxu2 %v1395_v10 }
  0x47   : > { %892 = vmatpush.bf16.msrb.mxu3 %v1403_v11 }
  0x48   : > { %714 = vmatpush.bf16.msrb.mxu0 %v1378_v14 }
  0x49   : > { %727 = vmatpush.bf16.msrb.mxu1 %v1386_v15 }
  0x4a   : > { %880 = vmatpush.bf16.msrb.mxu2 %v1394_v18 }
  0x4b   : > { %893 = vmatpush.bf16.msrb.mxu3 %v1402_v19  ;;  %715 = vmatmul.bf16.vlgmr.msrb.gmra.mxu0 %v607_v20 }
  0x4c   : > { %728 = vmatmul.bf16.vlgmr.msrb.gmra.mxu1 %v608_v21 }
  0x4d   : > { %881 = vmatmul.bf16.vlgmr.msrb.gmra.mxu2 %v773_v22 }
  0x4e   : > { %894 = vmatmul.bf16.vlgmr.msrb.gmra.mxu3 %v774_v23 }
  0xa8   : > { %v422_v24 = vpop.f32.mrf.mxu0 }
  0xa9   : > { %v435_v25 = vpop.f32.mrf.mxu1 }
  0xaa   : > { %v436_v32 = vadd.f32 %v435_v25, %v422_v24 }
  0xb0   : > { %v551_v26 = vpop.f32.mrf.mxu2  ;;  %v424_v28 = vpop.f32.mrf.mxu0 }
  0xb1   : > { %v564_v27 = vpop.f32.mrf.mxu3  ;;  %v437_v29 = vpop.f32.mrf.mxu1  ;;  %v552_v35 = vadd.f32 %v551_v26, %v436_v32 }
  0xb3   : > { %v565_v37 = vadd.f32 %v564_v27, %v552_v35 }
  0xb8   : > { %v553_v30 = vpop.f32.mrf.mxu2 }
  0xb9   : > { %v566_v31 = vpop.f32.mrf.mxu3 }
  0xc8   : > { %v716_v33 = vpop.f32.mrf.mxu0 }
  0xc9   : > { %v729_v34 = vpop.f32.mrf.mxu1 }
  0xca   : > { %v730_v36 = vadd.f32 %v729_v34, %v716_v33 }
  0xcc   : > { %v733_v40 = vadd.f32 %v730_v36, %v565_v37 }
  0xd0   : > { %v882_v38 = vpop.f32.mrf.mxu2  ;;  %v718_v43 = vpop.f32.mrf.mxu0 }
  0xd1   : > { %v895_v39 = vpop.f32.mrf.mxu3  ;;  %v731_v44 = vpop.f32.mrf.mxu1 }
  0xd2   : > { %v896_v41 = vadd.f32 %v895_v39, %v882_v38 }
  0xd4   : > { %v899_v45 = vadd.f32 %v896_v41, %v733_v40 }
  0xd6   : > { %v904_v46 = vadd.f32 %v1418_v42, %v899_v45 }
  0xd8   : > { %vm905_vm0 = vcmp.gt.f32.partialorder %v904_v46, 0.0  ;;  %v906_v48 = vmul.f32 0.2, %v904_v46  ;;  %v884_v49 = vpop.f32.mrf.mxu2 }
  0xd9   : > { %v897_v50 = vpop.f32.mrf.mxu3 }
  0xda   : > { %v907_v51 = vsel %vm905_vm0, %v904_v46, %v906_v48 }
  0xdb   : > { %v912_v52 = vadd.f32 %v1419_v47, %v907_v51 }
  0xdd   : > { %v913_v53 = vpack.c.bf16 %v912_v52, %v912_v52 }
  0xdf   : > { %914 = vst [vmem:[%s242_s25] sm:$0x3] %v913_v53 }
  0xe0 PF: > { %s15_s18 = sadd.s32 1, %s1426_s18  }
  0xe1   : > { %p12_p4 = scmp.ge.s32.totalorder %s15_s18, 5  }
  0xe3   :  { %14 = sbr.rel (!%p12_p4) target bundleno = 1 (0x1), region = 76 }

</bundles_post_ra>
